<compile_context>
chip_gen: v7x
topology: tpu7x:2x2x1
jax: 0.10.0
libtpu: 0.0.40
codegen_flags: <defaults>
</compile_context>

<pallas_src>
import jax
import jax.numpy as jnp
from jax.experimental import pallas as pl
from jax.experimental.pallas import tpu as pltpu


def _final_layer_kernel(x_ref, c_ref, w_ada_ref, b_ada_ref,
                        w_lin_ref, b_lin_ref, o_ref):
    C = x_ref.shape[-1]

    # f32 activations straight from HBM; all elementwise math stays f32.
    x = x_ref[...].astype(jnp.float32)                     # (tb, C)
    c = c_ref[...].astype(jnp.float32)                     # (tb, C)

    # adaLN_modulation: SiLU in f32, cast to bf16 only for the MXU operand.
    silu_c = (c * jax.nn.sigmoid(c)).astype(jnp.bfloat16)

    # Single fused adaLN matmul: (tb, C) @ (C, 2C) -> (tb, 2C), f32 accumulate.
    # Split point C is lane-tile aligned when C % 128 == 0, so the slices are
    # free (no cross-(8,128) copies).
    ada = jnp.dot(silu_c, w_ada_ref[...],
                  preferred_element_type=jnp.float32) + b_ada_ref[...]
    shift = ada[:, :C]
    scale = ada[:, C:]

    # LayerNorm (no elementwise affine, eps=1e-6) in f32.
    mean = jnp.mean(x, axis=-1, keepdims=True)
    xm = x - mean
    var = jnp.mean(xm * xm, axis=-1, keepdims=True)
    xn = xm * jax.lax.rsqrt(var + 1e-6)

    # modulate; cast to bf16 only right before the final MXU matmul.
    y = (xn * (1.0 + scale) + shift).astype(jnp.bfloat16)

    out = jnp.dot(y, w_lin_ref[...],
                  preferred_element_type=jnp.float32) + b_lin_ref[...]
    o_ref[...] = out.astype(o_ref.dtype)


def final_layer_init(w_ada, b_ada, w_lin, b_lin):
    """One-time weight preprocessing (hoisted out of the per-call path).

    w_ada: (C, 2C)  == torch adaLN Linear weight .T   (first C cols -> shift,
                       last C cols -> scale, matching torch chunk(2, dim=-1))
    b_ada: (2C,)
    w_lin: (C, out_channels) == torch linear weight .T
    b_lin: (out_channels,)
    """
    C = w_ada.shape[0]
    out_channels = w_lin.shape[1]
    return {
        "C": C,
        "out_channels": out_channels,
        "w_ada": w_ada.astype(jnp.bfloat16),                       # (C, 2C)
        "b_ada": b_ada.reshape(1, 2 * C).astype(jnp.float32),      # (1, 2C)
        "w_lin": w_lin.astype(jnp.bfloat16),                       # (C, oc)
        "b_lin": b_lin.reshape(1, out_channels).astype(jnp.float32),
    }


def final_layer_apply(params, x, c, *, tile_b=256, out_dtype=jnp.bfloat16):
    """out = Linear(modulate(LayerNorm(x), *chunk(Linear(SiLU(c)), 2)))."""
    B, C = x.shape
    assert C == params["C"]
    out_channels = params["out_channels"]

    # Batch tiling: large tiles fill the MXU M-dim and amortize per-step
    # overhead.  Keep the grid >= 2 (and "parallel") so v7x's two TensorCores
    # both get work; on single-TC v5e/v6e a larger tile_b (512-1024 or B)
    # shaves a little more per-step overhead.
    tile_b = min(tile_b, B)
    assert B % tile_b == 0, f"B={B} must be divisible by tile_b={tile_b}"
    assert tile_b % 16 == 0 or tile_b == B, \
        "tile_b must be a multiple of 16 (bf16 sublane pack)"
    grid = (B // tile_b,)

    # TODO(synk): if c is per-sample conditioning shared across many tokens
    # (standard DiT: x is (B*T, C), c is (B, C)), hoist SiLU+adaLN out of this
    # kernel and pass shift/scale in directly, indexed via scalar prefetch.
    # TODO(synk): at DiT-scale C on v7x (64 MiB VMEM), single-buffer the
    # resident weight BlockSpecs with pipeline_mode=pl.Buffered(1); at C=128
    # the weights are ~100 KB so the extra buffer is negligible.

    return pl.pallas_call(
        _final_layer_kernel,
        out_shape=jax.ShapeDtypeStruct((B, out_channels), out_dtype),
        grid_spec=pltpu.PrefetchScalarGridSpec(
            num_scalar_prefetch=0,
            grid=grid,
            in_specs=[
                pl.BlockSpec((tile_b, C), lambda i: (i, 0)),        # x tile (f32)
                pl.BlockSpec((tile_b, C), lambda i: (i, 0)),        # c tile (f32)
                pl.BlockSpec((C, 2 * C), lambda i: (0, 0)),         # W_ada (resident, bf16)
                pl.BlockSpec((1, 2 * C), lambda i: (0, 0)),         # b_ada (f32)
                pl.BlockSpec((C, out_channels), lambda i: (0, 0)),  # W_lin (resident, bf16)
                pl.BlockSpec((1, out_channels), lambda i: (0, 0)),  # b_lin (f32)
            ],
            out_specs=pl.BlockSpec((tile_b, out_channels), lambda i: (i, 0)),
        ),
        compiler_params=pltpu.CompilerParams(
            dimension_semantics=("parallel",),
        ),
    )(x, c, params["w_ada"], params["b_ada"], params["w_lin"], params["b_lin"])


def final_layer_ref(x, c, w_ada, b_ada, w_lin, b_lin):
    """Pure-JAX f32 reference matching the PyTorch forward."""
    x = x.astype(jnp.float32)
    c = c.astype(jnp.float32)
    silu_c = c * jax.nn.sigmoid(c)
    ada = silu_c @ w_ada + b_ada
    C = x.shape[-1]
    shift, scale = ada[:, :C], ada[:, C:]
    mean = jnp.mean(x, axis=-1, keepdims=True)
    var = jnp.mean((x - mean) ** 2, axis=-1, keepdims=True)
    xn = (x - mean) / jnp.sqrt(var + 1e-6)
    y = xn * (1.0 + scale) + shift
    return y @ w_lin + b_lin


if __name__ == "__main__":
    # Module-consistent shapes; C is lane-dense (128), B gives a grid of 2
    # tiles so both v7x TensorCores get work.
    B = 512
    model_channels = 128
    out_channels = 16

    key = jax.random.PRNGKey(0)
    kx, kc, kwa, kba, kwl, kbl = jax.random.split(key, 6)

    x = jax.random.normal(kx, (B, model_channels), dtype=jnp.float32)
    c = jax.random.normal(kc, (B, model_channels), dtype=jnp.float32)

    # adaLN_modulation[1]: Linear(C -> 2C, bias); linear: Linear(C -> out, bias)
    w_ada = 0.05 * jax.random.normal(
        kwa, (model_channels, 2 * model_channels), dtype=jnp.float32)
    b_ada = 0.01 * jax.random.normal(
        kba, (2 * model_channels,), dtype=jnp.float32)
    w_lin = 0.05 * jax.random.normal(
        kwl, (model_channels, out_channels), dtype=jnp.float32)
    b_lin = 0.01 * jax.random.normal(
        kbl, (out_channels,), dtype=jnp.float32)

    # One-time weight preprocessing, then the lean per-call path.
    params = final_layer_init(w_ada, b_ada, w_lin, b_lin)
    out = final_layer_apply(params, x, c, tile_b=256)
    out = jax.block_until_ready(out)

    ref = final_layer_ref(x, c, w_ada, b_ada, w_lin, b_lin)
    assert out.shape == (B, out_channels)
    max_err = float(jnp.max(jnp.abs(out.astype(jnp.float32) - ref)))
    # bf16 MXU operands + bf16 output (f32 accumulation / LayerNorm) ->
    # looser tolerance than pure f32.
    assert max_err < 5e-2, f"mismatch vs reference: max abs err {max_err}"

    print("KERNEL_OK")
</pallas_src>

<mosaic_0001>
module attributes {stable_mosaic.version = 11 : i64} {
  func.func @_final_layer_kernel(%arg0: i32, %arg1: memref<256x128xf32, #tpu.memory_space<vmem>>, %arg2: memref<256x128xf32, #tpu.memory_space<vmem>>, %arg3: memref<128x256xbf16, #tpu.memory_space<vmem>>, %arg4: memref<1x256xf32, #tpu.memory_space<vmem>>, %arg5: memref<128x16xbf16, #tpu.memory_space<vmem>>, %arg6: memref<1x16xf32, #tpu.memory_space<vmem>>, %arg7: memref<256x16xbf16, #tpu.memory_space<vmem>>) attributes {dimension_semantics = [#tpu.dimension_semantics<parallel>], iteration_bounds = array<i64: 2>, scalar_prefetch = 0 : i64, scratch_operands = 0 : i64, tpu.core_type = #tpu.core_type<tc>, window_params = [{transform_indices = @transform_0, window_bounds = array<i64: 256, 128>}, {transform_indices = @transform_1, window_bounds = array<i64: 256, 128>}, {pipeline_mode = #tpu.pipeline_mode<synchronous>, transform_indices = @transform_2, window_bounds = array<i64: 128, 256>}, {pipeline_mode = #tpu.pipeline_mode<synchronous>, transform_indices = @transform_3, window_bounds = array<i64: 1, 256>}, {pipeline_mode = #tpu.pipeline_mode<synchronous>, transform_indices = @transform_4, window_bounds = array<i64: 128, 16>}, {pipeline_mode = #tpu.pipeline_mode<synchronous>, transform_indices = @transform_5, window_bounds = array<i64: 1, 16>}, {transform_indices = @transform_6, window_bounds = array<i64: 256, 16>}]} {
    %c0 = arith.constant 0 : index
    %c0_0 = arith.constant 0 : index
    %0 = vector.load %arg1[%c0, %c0_0] : memref<256x128xf32, #tpu.memory_space<vmem>>, vector<256x128xf32>
    %c0_1 = arith.constant 0 : index
    %c0_2 = arith.constant 0 : index
    %1 = vector.load %arg2[%c0_1, %c0_2] : memref<256x128xf32, #tpu.memory_space<vmem>>, vector<256x128xf32>
    %2 = arith.negf %1 : vector<256x128xf32>
    %3 = math.exp %2 : vector<256x128xf32>
    %cst = arith.constant 1.000000e+00 : f32
    %4 = vector.broadcast %cst : f32 to vector<256x128xf32>
    %5 = arith.addf %4, %3 : vector<256x128xf32>
    %6 = arith.divf %4, %5 : vector<256x128xf32>
    %7 = arith.mulf %1, %6 : vector<256x128xf32>
    %8 = arith.truncf %7 : vector<256x128xf32> to vector<256x128xbf16>
    %c0_3 = arith.constant 0 : index
    %c0_4 = arith.constant 0 : index
    %9 = vector.load %arg3[%c0_3, %c0_4] : memref<128x256xbf16, #tpu.memory_space<vmem>>, vector<128x256xbf16>
    %cst_5 = arith.constant dense<0.000000e+00> : vector<256x256xf32>
    %10 = tpu.matmul %8, %9, %cst_5 {dimension_numbers = #tpu.dot_dimension_numbers<[1], [0], [0], [1], [0, 0, 1, 1], [], []>} : vector<256x128xbf16>, vector<128x256xbf16>, vector<256x256xf32> -> vector<256x256xf32>
    %c0_6 = arith.constant 0 : index
    %c0_7 = arith.constant 0 : index
    %11 = vector.load %arg4[%c0_6, %c0_7] : memref<1x256xf32, #tpu.memory_space<vmem>>, vector<1x256xf32>
    %12 = vector.broadcast %11 : vector<1x256xf32> to vector<256x256xf32>
    %13 = arith.addf %10, %12 : vector<256x256xf32>
    %14 = vector.extract_strided_slice %13 {offsets = [0, 0], sizes = [256, 128], strides = [1, 1]} : vector<256x256xf32> to vector<256x128xf32>
    %15 = vector.extract_strided_slice %13 {offsets = [0, 128], sizes = [256, 128], strides = [1, 1]} : vector<256x256xf32> to vector<256x128xf32>
    %cst_8 = arith.constant dense<0.000000e+00> : vector<256xf32>
    %16 = vector.multi_reduction <add>, %0, %cst_8 [1] : vector<256x128xf32> to vector<256xf32>
    %17 = vector.shape_cast %16 : vector<256xf32> to vector<256x1xf32>
    %cst_9 = arith.constant 1.280000e+02 : f32
    %18 = vector.broadcast %cst_9 : f32 to vector<256x1xf32>
    %19 = arith.divf %17, %18 : vector<256x1xf32>
    %20 = vector.broadcast %19 : vector<256x1xf32> to vector<256x128xf32>
    %21 = arith.subf %0, %20 : vector<256x128xf32>
    %22 = arith.mulf %21, %21 : vector<256x128xf32>
    %cst_10 = arith.constant dense<0.000000e+00> : vector<256xf32>
    %23 = vector.multi_reduction <add>, %22, %cst_10 [1] : vector<256x128xf32> to vector<256xf32>
    %24 = vector.shape_cast %23 : vector<256xf32> to vector<256x1xf32>
    %cst_11 = arith.constant 1.280000e+02 : f32
    %25 = vector.broadcast %cst_11 : f32 to vector<256x1xf32>
    %26 = arith.divf %24, %25 : vector<256x1xf32>
    %cst_12 = arith.constant 9.99999997E-7 : f32
    %27 = vector.broadcast %cst_12 : f32 to vector<256x1xf32>
    %28 = arith.addf %26, %27 : vector<256x1xf32>
    %29 = math.rsqrt %28 : vector<256x1xf32>
    %30 = vector.broadcast %29 : vector<256x1xf32> to vector<256x128xf32>
    %31 = arith.mulf %21, %30 : vector<256x128xf32>
    %cst_13 = arith.constant 1.000000e+00 : f32
    %32 = vector.broadcast %cst_13 : f32 to vector<256x128xf32>
    %33 = arith.addf %32, %15 : vector<256x128xf32>
    %34 = arith.mulf %31, %33 : vector<256x128xf32>
    %35 = arith.addf %34, %14 : vector<256x128xf32>
    %36 = arith.truncf %35 : vector<256x128xf32> to vector<256x128xbf16>
    %c0_14 = arith.constant 0 : index
    %c0_15 = arith.constant 0 : index
    %37 = vector.load %arg5[%c0_14, %c0_15] : memref<128x16xbf16, #tpu.memory_space<vmem>>, vector<128x16xbf16>
    %cst_16 = arith.constant dense<0.000000e+00> : vector<256x16xf32>
    %38 = tpu.matmul %36, %37, %cst_16 {dimension_numbers = #tpu.dot_dimension_numbers<[1], [0], [0], [1], [0, 0, 1, 1], [], []>} : vector<256x128xbf16>, vector<128x16xbf16>, vector<256x16xf32> -> vector<256x16xf32>
    %c0_17 = arith.constant 0 : index
    %c0_18 = arith.constant 0 : index
    %39 = vector.load %arg6[%c0_17, %c0_18] : memref<1x16xf32, #tpu.memory_space<vmem>>, vector<1x16xf32>
    %40 = vector.broadcast %39 : vector<1x16xf32> to vector<256x16xf32>
    %41 = arith.addf %38, %40 : vector<256x16xf32>
    %42 = arith.truncf %41 : vector<256x16xf32> to vector<256x16xbf16>
    %c0_19 = arith.constant 0 : index
    %c0_20 = arith.constant 0 : index
    %43 = vector.load %arg7[%c0_19, %c0_20] : memref<256x16xbf16, #tpu.memory_space<vmem>>, vector<256x16xbf16>
    tpu.vector_store %arg7[%c0_19, %c0_20], %42 {strides = array<i32>} : memref<256x16xbf16, #tpu.memory_space<vmem>>, vector<256x16xbf16>,
    return
  }
  func.func @transform_0(%arg0: i32) -> (i32, i32) {
    %c0_i32 = arith.constant 0 : i32
    %c0_i32_0 = arith.constant 0 : i32
    return %arg0, %c0_i32 : i32, i32
  }
  func.func @transform_1(%arg0: i32) -> (i32, i32) {
    %c0_i32 = arith.constant 0 : i32
    %c0_i32_0 = arith.constant 0 : i32
    return %arg0, %c0_i32 : i32, i32
  }
  func.func @transform_2(%arg0: i32) -> (i32, i32) {
    %c0_i32 = arith.constant 0 : i32
    %c0_i32_0 = arith.constant 0 : i32
    %c0_i32_1 = arith.constant 0 : i32
    return %c0_i32, %c0_i32_0 : i32, i32
  }
  func.func @transform_3(%arg0: i32) -> (i32, i32) {
    %c0_i32 = arith.constant 0 : i32
    %c0_i32_0 = arith.constant 0 : i32
    %c0_i32_1 = arith.constant 0 : i32
    return %c0_i32, %c0_i32_0 : i32, i32
  }
  func.func @transform_4(%arg0: i32) -> (i32, i32) {
    %c0_i32 = arith.constant 0 : i32
    %c0_i32_0 = arith.constant 0 : i32
    %c0_i32_1 = arith.constant 0 : i32
    return %c0_i32, %c0_i32_0 : i32, i32
  }
  func.func @transform_5(%arg0: i32) -> (i32, i32) {
    %c0_i32 = arith.constant 0 : i32
    %c0_i32_0 = arith.constant 0 : i32
    %c0_i32_1 = arith.constant 0 : i32
    return %c0_i32, %c0_i32_0 : i32, i32
  }
  func.func @transform_6(%arg0: i32) -> (i32, i32) {
    %c0_i32 = arith.constant 0 : i32
    %c0_i32_0 = arith.constant 0 : i32
    return %arg0, %c0_i32 : i32, i32
  }
}

</mosaic_0001>

<bundles_post_ra>
// kernel: tpu_custom_call.1
= control target key start
LH: loop header
LB: loop body
LE: loop exit
PB: predicated region body
PF: predicated region fallthrough
CT: control target
= control target key end

     0   :  { %11 = vsyncpa [#allocation3], 0  ;;  %s3641_s0 = inlined_call_operand.hbm [shape: f32[512,128], index: 0, kind: input, shape index: {}]   ;;  %s3642_s1 = inlined_call_operand.hbm [shape: f32[512,128], index: 1, kind: input, shape index: {}]   ;;  %s3643_s2 = inlined_call_operand.hbm [shape: bf16[128,256], index: 2, kind: input, shape index: {}]   ;;  %s3644_s3 = inlined_call_operand.vmem [shape: f32[1,256], index: 3, kind: input, shape index: {}]   ;;  %s3645_s4 = inlined_call_operand.vmem [shape: bf16[128,16], index: 4, kind: input, shape index: {}]   ;;  %s3646_s5 = inlined_call_operand.vmem [shape: f32[1,16], index: 5, kind: input, shape index: {}]   ;;  %s3647_s6 = inlined_call_operand.vmem [shape: bf16[512,16], index: 6, kind: output, shape index: {}]  }
   0x1   :  { %13 = vsyncpa [#allocation3 + $0x1], 0 }
   0x2   :  { %14 = vsyncpa [#allocation5], 0 }
   0x3   :  { %16 = vsyncpa [#allocation5 + $0x1], 0  ;;  %s2577_s21 = smov 0   ;;  %s2579_s22 = smov 0  }
   0x4   :  { %s2581_s23 = smov 0   ;;  %s2583_s24 = smov 0  }
   0x5 LB: > { %s2596_s25 = sadd.s32 4294967295, %s2534_s24   ;;  %p42_p0 = scmp.ne.s32.totalorder %s2526_s22, %s2522_s21  ;;  %s2534_s24 = sphi %s2583_s24, %s3733_s24   ;;  %s2530_s23 = sphi %s2581_s23, %s3732_s23   ;;  %s2526_s22 = sphi %s2579_s22, %s3731_s22   ;;  %s2522_s21 = sphi %s2577_s21, %s3730_s21  }
   0x6   : > { %p3648_p1 = scmp.eq.s32.totalorder %s2596_s25, 0  ;;  %p1894_p2 = scmp.ge.s32.totalorder %s2534_s24, 1 }
   0x7   : > { %p189_p3 = scmp.lt.s32.totalorder %s2534_s24, 3  ;;  %s2536_s28 = smov [#allocation6]  }
   0x8   : > { %p2604_p4 = por %p3648_p1, %p42_p0  ;;  %s201_s29 = sshll.u32 %s2536_s28, 4  ;;  %s202_s29 = int_to_ptr.vmem [resolvable:$true] %s201_s29 }
   0x9   : > { %p2608_p5 = pnand %p1894_p2, %p189_p3  ;;  %s2621_s7 = sadd.s32 1, %s2534_s24  }
   0xa   : > { %s3674_s26 = scalar_select %p2604_p4, 1, 0 }
   0xb   : > { %s3675_s27 = scalar_select %p2608_p5, 1, 0 }
   0xc   : > { %p2130_p6 = pneg %p2608_p5  ;;  %s29_s8 = sadd.s32 1, %s2530_s23 }
   0xd   : > { %s26_s9 = ssub.s32 %s2534_s24, %s2621_s7  ;;  %s2404_s12 = scalar_lea.hbm %s3643_s2, 2048 }
   0xe   : > { %p2616_p7 = pnand %p2130_p6, %p3648_p1  ;;  %p2405_p8 = scmp.ne.s32.totalorder %s3643_s2, %s2404_s12 }
   0xf   : > { %p2411_p12 = scmp.lt.u32.totalorder %s2404_s12, %s3643_s2 }
  0x10   : > { %p2406_p9 = pneg %p2616_p7 }
  0x12   : > { %p2407_p10 = pnand %p2406_p9, %p2405_p8 }
  0x14   : > { %p2408_p11 = pneg %p2407_p10 }
  0x16   : > { %p2413_p13 = pnand %p2411_p12, %p2408_p11 }
  0x18   : > { %2416 = shalt.err (!%p2413_p13)
}
  0x19   : > { %s2417_s17 = scalar_lea.vmem %s202_s29, 2048  ;;  %p2425_p6 = scmp.lt.s32.totalorder %s202_s29, %s202_s29 }
  0x1a   : > { %p2418_p0 = scmp.ne.s32.totalorder %s202_s29, %s2417_s17  ;;  %p2426_p1 = scmp.lt.s32.totalorder %s2417_s17, %s2417_s17 }
  0x1c   : > { %p2420_p2 = pnand %p2418_p0, %p2406_p9  ;;  %p2427_p4 = por %p2426_p1, %p2425_p6 }
  0x1e   : > { %p2421_p3 = pneg %p2420_p2 }
  0x20   : > { %p2428_p5 = pnand %p2427_p4, %p2421_p3 }
  0x22   : > { %2431 = shalt.err (!%p2428_p5)
}
  0x23   : > { %s3651_s18 = smov 128   ;;  %s2538_s19 = smov 8  }
  0x24   : > { %2133 = dma.hbm_to_vmem [thread:$0]  (!%p2616_p7), %s3643_s2, 2048, %s202_s29, [#allocation5], %s3651_s18, %s3651_s18, %s2538_s19  }
  0x25   : > { %p27_p1 = scmp.eq.s32.totalorder %s26_s9, 0  ;;  %p36_p4 = scmp.ne.s32.totalorder %s2530_s23, %s2526_s22 }
  0x26   : > { %p37_p5 = scmp.eq.s32.totalorder %s2534_s24, 0  ;;  %p2142_p8 = scmp.lt.s32.totalorder %s2534_s24, 2 }
  0x27   : > { %s2650_s28 = scalar_select %p27_p1, %s2530_s23, %s29_s8  }
  0x28   : > { %p38_p9 = por %p37_p5, %p36_p4  ;;  %s224_s10 = sand.u32 1, %s2530_s23  }
  0x29   : > { %s1897_s11 = sshll.u32 %s224_s10, 8  ;;  %s2000_s12 = sshll.u32 %s2534_s24, 12 }
  0x2a   : > { %s2657_s30 = scalar_lea.hbm %s3641_s0, %s2000_s12  ;;  %s228_s15 = scalar_lea.vmem [#allocation2], %s1897_s11 }
  0x2b   : > { %s235_s29 = sshll.u32 %s228_s15, 4  ;;  %p2661_p7 = pnand %p2142_p8, %p38_p9  ;;  %s2659_s29 = int_to_ptr.vmem [resolvable:$true] %s235_s29 }
  0x2c   : > { %s2668_s17 = scalar_lea.hbm %s3642_s1, %s2000_s12  ;;  %s249_s20 = scalar_lea.vmem [#allocation4], %s1897_s11 }
  0x2d   : > { %s2670_s21 = sshll.u32 %s249_s20, 4  ;;  %s2672_s13 = scalar_lea.sflag [#allocation3], %s224_s10  ;;  %s2704_s21 = int_to_ptr.vmem [resolvable:$true] %s2670_s21 }
  0x2e   : > { %s2432_s14 = scalar_lea.hbm %s2657_s30, 4096  ;;  %p2434_p11 = pneg %p2661_p7 }
  0x2f   : > { %p2433_p10 = scmp.ne.s32.totalorder %s2657_s30, %s2432_s14  ;;  %s2437_s9 = scalar_lea.hbm %s3641_s0, 8192 }
  0x30   : > { %p2438_p0 = scmp.lt.u32.totalorder %s2657_s30, %s3641_s0  ;;  %p2439_p2 = scmp.lt.u32.totalorder %s2437_s9, %s2432_s14 }
  0x31   : > { %p2435_p12 = pnand %p2434_p11, %p2433_p10  ;;  %p2441_p6 = scmp.lt.u32.totalorder %s2432_s14, %s2657_s30 }
  0x32   : > { %p2440_p3 = por %p2439_p2, %p2438_p0 }
  0x33   : > { %p2436_p13 = pneg %p2435_p12 }
  0x34   : > { %p2442_p1 = por %p2441_p6, %p2440_p3 }
  0x36   : > { %p2443_p4 = pnand %p2442_p1, %p2436_p13 }
  0x38   : > { %2446 = shalt.err (!%p2443_p4)
}
  0x39   : > { %s2447_s10 = scalar_lea.vmem %s2659_s29, 4096  ;;  %s2539_s18 = smov [#allocation2]  }
  0x3a   : > { %p2448_p5 = scmp.ne.s32.totalorder %s2659_s29, %s2447_s10  ;;  %s2452_s11 = sshll.u32 %s2539_s18, 4  ;;  %s2453_s11 = int_to_ptr.vmem [resolvable:$false] %s2452_s11 }
  0x3b   : > { %s2454_s20 = scalar_lea.vmem %s2453_s11, 8192  ;;  %p2455_p10 = scmp.lt.s32.totalorder %s2659_s29, %s2453_s11 }
  0x3c   : > { %p2450_p8 = pnand %p2448_p5, %p2434_p11  ;;  %p2456_p12 = scmp.lt.s32.totalorder %s2454_s20, %s2447_s10 }
  0x3e   : > { %p2451_p9 = pneg %p2450_p8  ;;  %p2457_p0 = por %p2456_p12, %p2455_p10 }
  0x40   : > { %p2458_p2 = pnand %p2457_p0, %p2451_p9 }
  0x42   : > { %2461 = shalt.err (!%p2458_p2)
}
  0x43   : > { %s3678_s14 = smov 128   ;;  %s245_s15 = sand.u32 1, %s2534_s24  }
  0x44   : > { %2137 = dma.hbm_to_vmem [thread:$0]  (!%p2661_p7), %s2657_s30, 4096, %s2659_s29, %s2672_s13, %s3678_s14, %s3678_s14, %s2538_s19  }
  0x45   : > { %s2707_s9 = scalar_lea.sflag [#allocation5], %s245_s15  ;;  %s2462_s16 = scalar_lea.hbm %s2668_s17, 4096 }
  0x46   : > { %p2463_p13 = scmp.ne.s32.totalorder %s2668_s17, %s2462_s16  ;;  %s2467_s18 = scalar_lea.hbm %s3642_s1, 8192 }
  0x47   : > { %p2468_p1 = scmp.lt.u32.totalorder %s2668_s17, %s3642_s1  ;;  %p2469_p4 = scmp.lt.u32.totalorder %s2467_s18, %s2462_s16 }
  0x48   : > { %p2465_p3 = pnand %p2463_p13, %p2434_p11  ;;  %p2471_p8 = scmp.lt.u32.totalorder %s2462_s16, %s2668_s17 }
  0x49   : > { %p2470_p5 = por %p2469_p4, %p2468_p1 }
  0x4a   : > { %p2466_p6 = pneg %p2465_p3 }
  0x4b   : > { %p2472_p9 = por %p2471_p8, %p2470_p5 }
  0x4d   : > { %p2473_p10 = pnand %p2472_p9, %p2466_p6 }
  0x4f   : > { %2476 = shalt.err (!%p2473_p10)
}
  0x50   : > { %s2477_s24 = scalar_lea.vmem %s2704_s21, 4096  ;;  %s2540_s30 = smov [#allocation4]  }
  0x51   : > { %p2478_p12 = scmp.ne.s32.totalorder %s2704_s21, %s2477_s24  ;;  %s2482_s29 = sshll.u32 %s2540_s30, 4  ;;  %s2483_s29 = int_to_ptr.vmem [resolvable:$false] %s2482_s29 }
  0x52   : > { %s2484_s13 = scalar_lea.vmem %s2483_s29, 8192  ;;  %p2485_p13 = scmp.lt.s32.totalorder %s2704_s21, %s2483_s29 }
  0x53   : > { %p2480_p0 = pnand %p2478_p12, %p2434_p11  ;;  %p2486_p3 = scmp.lt.s32.totalorder %s2484_s13, %s2477_s24 }
  0x55   : > { %p2481_p2 = pneg %p2480_p0  ;;  %p2487_p1 = por %p2486_p3, %p2485_p13 }
  0x57   : > { %p2488_p4 = pnand %p2487_p1, %p2481_p2 }
  0x59   : > { %2491 = shalt.err (!%p2488_p4)
}
  0x5a   : > { %2140 = dma.hbm_to_vmem [thread:$0]  (!%p2661_p7), %s2668_s17, 4096, %s2704_s21, %s2707_s9, %s3678_s14, %s3678_s14, %s2538_s19  }
  0x5b   : > { %p3679_p11 = scmp.ne.s32.totalorder %s3675_s27, 0 }
  0x5d   : > { %268 = sbr.rel (%p3679_p11) target bundleno = 713 (0x2c9), region = 44 }
  0x64   : > { %s270_s15 = sand.u32 1, %s2526_s22   ;;  %p3680_p6 = scmp.ne.s32.totalorder %s3674_s26, 0 }
  0x65   : > { %s1904_s16 = sshll.u32 %s270_s15, 8  ;;  %s271_s12 = scalar_lea.sflag [#allocation3], %s270_s15 }
  0x66   : > { %s2739_s10 = scalar_lea.vmem [#allocation2], %s1904_s16 }
  0x67   : > { %2509 = dma.done.wait (%p3680_p6), %s271_s12, 4096  }
  0x68   : > { %2511 = vsyncadd (%p3680_p6), %s271_s12, 4294963200  ;;  %s279_s8 = sand.u32 1, %s2596_s25   ;;  %s2746_s19 = scalar_lea.vmem [#allocation4], %s1904_s16 }
  0x69   : > { %s280_s18 = scalar_lea.sflag [#allocation5], %s279_s8 }
  0x6a   : > { %2513 = dma.done.wait (%p3680_p6), %s280_s18, 4096  }
  0x6b   : > { %2515 = vsyncadd (%p3680_p6), %s280_s18, 4294963200  ;;  %p3681_p7 = scmp.eq.s32.totalorder %s2596_s25, 0 }
  0x6d   : > { %2517 = dma.done.wait (%p3681_p7), [#allocation5], 2048   ;;  %p3682_p5 = pmov %p3681_p7 }
  0x6e   : > { %v3653_v0 = vmov 0   ;;  %v2759_v1 = vld [vmem:[%s2739_s10] sm:$0xff]  ;;  %v2762_v2 = vld [vmem:[%s2739_s10 + $0x10] sm:$0xff]  ;;  %v2767_v3 = vld [vmem:[%s2739_s10 + $0x8] sm:$0xff]  ;;  %vm1760_vm0 = vcmask 125952  }
  0x6f   : > { %2519 = vsyncadd (%p3682_p5), [#allocation5], 4294965248  ;;  %774 = vmatprep.mubr.bf16.mxu0 %v3653_v0  ;;  %894 = vmatprep.mubr.bf16.mxu1 %v3653_v0  ;;  %v2770_v4 = vld [vmem:[%s2739_s10 + $0x18] sm:$0xff]  ;;  %v2180_v5 = vld [vmem:[#allocation6 + $0x4] ss:$8 sps:$4 sm:$0xff]  }
  0x70   : > { %935 = vadd.xlane.f32.xlu0 %v2759_v1  ;;  %939 = vadd.xlane.f32.xlu1 %v2762_v2  ;;  %v2182_v6 = vld [vmem:[#allocation6] ss:$8 sps:$4 sm:$0xff]   ;;  %v2183_v8 = vld [vmem:[#allocation6 + $0x14] ss:$8 sps:$4 sm:$0xff]   ;;  %v2185_v10 = vld [vmem:[#allocation6 + $0x10] ss:$8 sps:$4 sm:$0xff]  }
  0x71   : > { %v2775_v7 = vld [vmem:[%s2739_s10 + $0x20] sm:$0xff]  ;;  %v2778_v9 = vld [vmem:[%s2739_s10 + $0x28] sm:$0xff]  ;;  %742 = vmatprep.subr.bf16.mxu0 %v2180_v5  ;;  %2106 = vmatprep.subr.bf16.mxu1 %v2180_v5  ;;  %v2783_v12 = vld [vmem:[%s2739_s10 + $0x30] sm:$0xff] }
  0x72   : > { %743 = vmatpush1.bf16.msra.mxu0 %v2182_v6  ;;  %2114 = vmatpush1.bf16.msra.mxu1 %v2182_v6  ;;  %v2186_v11 = vld [vmem:[#allocation6 + $0x24] ss:$8 sps:$4 sm:$0xff]   ;;  %v2786_v13 = vld [vmem:[%s2739_s10 + $0x38] sm:$0xff]  ;;  %v2188_v14 = vld [vmem:[#allocation6 + $0x20] ss:$8 sps:$4 sm:$0xff]  }
  0x73   : > { %744 = vmatprep.subr.bf16.mxu0 %v2183_v8  ;;  %2107 = vmatprep.subr.bf16.mxu1 %v2183_v8  ;;  %v2189_v15 = vld [vmem:[#allocation6 + $0x34] ss:$8 sps:$4 sm:$0xff]   ;;  %v2791_v16 = vld [vmem:[%s2739_s10 + $0x40] sm:$0xff]  ;;  %v2794_v17 = vld [vmem:[%s2739_s10 + $0x48] sm:$0xff] }
  0x74   : > { %937 = vadd.xlane.f32.xlu0 %v2767_v3  ;;  %941 = vadd.xlane.f32.xlu1 %v2770_v4  ;;  %v2191_v18 = vld [vmem:[#allocation6 + $0x30] ss:$8 sps:$4 sm:$0xff]   ;;  %v2192_v19 = vld [vmem:[#allocation6 + $0x44] ss:$8 sps:$4 sm:$0xff]   ;;  %v2194_v24 = vld [vmem:[#allocation6 + $0x40] ss:$8 sps:$4 sm:$0xff]  }
  0x75   : > { %v2799_v20 = vld [vmem:[%s2739_s10 + $0x50] sm:$0xff]  ;;  %v2802_v21 = vld [vmem:[%s2739_s10 + $0x58] sm:$0xff]  ;;  %v2805_v22 = vld [vmem:[%s2746_s19] sm:$0xff] }
  0x76   : > { %745 = vmatpush1.bf16.msra.mxu0 %v2185_v10  ;;  %2115 = vmatpush1.bf16.msra.mxu1 %v2185_v10  ;;  %v2808_v23 = vld [vmem:[%s2746_s19 + $0x8] sm:$0xff]  ;;  %v1909_v25 = vmul.f32 -1.442695, %v2805_v22  ;;  %v2195_v27 = vld [vmem:[#allocation6 + $0x54] ss:$8 sps:$4 sm:$0xff]   ;;  %v2822_v31 = vld [vmem:[%s2739_s10 + $0x60] sm:$0xff] }
  0x77   : > { %746 = vmatprep.subr.bf16.mxu0 %v2186_v11  ;;  %2108 = vmatprep.subr.bf16.mxu1 %v2186_v11  ;;  %v1910_v26 = vmul.f32 -1.442695, %v2808_v23  ;;  %v2813_v28 = vld [vmem:[%s2746_s19 + $0x10] sm:$0xff]  ;;  %v2818_v29 = vld [vmem:[%s2746_s19 + $0x18] sm:$0xff]  ;;  %v2825_v32 = vld [vmem:[%s2739_s10 + $0x68] sm:$0xff] }
  0x78   : > { %943 = vadd.xlane.f32.xlu0 %v2775_v7  ;;  %945 = vadd.xlane.f32.xlu1 %v2778_v9  ;;  %2212 = vpow2.f32 %v1909_v25  ;;  %v1911_v30 = vmul.f32 -1.442695, %v2813_v28  ;;  %v1912_v33 = vmul.f32 -1.442695, %v2818_v29  ;;  %v2829_v34 = vld [vmem:[%s2746_s19 + $0x20] sm:$0xff]  ;;  %v2832_v36 = vld [vmem:[%s2746_s19 + $0x28] sm:$0xff] }
  0x79   : > { %2214 = vpow2.f32 %v1910_v26  ;;  %v2197_v35 = vld [vmem:[#allocation6 + $0x50] ss:$8 sps:$4 sm:$0xff]   ;;  %v1913_v37 = vmul.f32 -1.442695, %v2829_v34  ;;  %v2198_v38 = vld [vmem:[#allocation6 + $0x64] ss:$8 sps:$4 sm:$0xff]  }
  0x7a   : > { %747 = vmatpush1.bf16.msra.mxu0 %v2188_v14  ;;  %2116 = vmatpush1.bf16.msra.mxu1 %v2188_v14  ;;  %2216 = vpow2.f32 %v1911_v30  ;;  %v1914_v39 = vmul.f32 -1.442695, %v2832_v36  ;;  %v2839_v40 = vld [vmem:[%s2746_s19 + $0x30] sm:$0xff]  ;;  %v2845_v42 = vld [vmem:[%s2739_s10 + $0x78] sm:$0xff]  ;;  %v2200_v44 = vld [vmem:[#allocation6 + $0x60] ss:$8 sps:$4 sm:$0xff]  }
  0x7b   : > { %748 = vmatprep.subr.bf16.mxu0 %v2189_v15  ;;  %2109 = vmatprep.subr.bf16.mxu1 %v2189_v15  ;;  %2218 = vpow2.f32 %v1912_v33  ;;  %v2842_v41 = vld [vmem:[%s2739_s10 + $0x70] sm:$0xff]  ;;  %v2848_v43 = vld [vmem:[%s2746_s19 + $0x38] sm:$0xff]  ;;  %v1915_v46 = vmul.f32 -1.442695, %v2839_v40  ;;  %v2855_v48 = vld [vmem:[%s2739_s10 + $0x80] sm:$0xff] }
  0x7c   : > { %947 = vadd.xlane.f32.xlu0 %v2783_v12  ;;  %949 = vadd.xlane.f32.xlu1 %v2786_v13  ;;  %2220 = vpow2.f32 %v1913_v37  ;;  %v2201_v45 = vld [vmem:[#allocation6 + $0x74] ss:$8 sps:$4 sm:$0xff]   ;;  %v1916_v47 = vmul.f32 -1.442695, %v2848_v43  ;;  %v2858_v49 = vld [vmem:[%s2739_s10 + $0x88] sm:$0xff]  ;;  %v2869_v61 = vld [vmem:[%s2746_s19 + $0x40] sm:$0xff] }
  0x7d   : > { %2222 = vpow2.f32 %v1914_v39  ;;  %v2203_v51 = vld [vmem:[#allocation6 + $0x70] ss:$8 sps:$4 sm:$0xff]   ;;  %v2872_v62 = vld [vmem:[%s2746_s19 + $0x48] sm:$0xff]  ;;  %v2877_v5 = vld [vmem:[%s2739_s10 + $0xa0] sm:$0xff]  ;;  %v1917_v10 = vmul.f32 -1.442695, %v2869_v61 }
  0x7e   : > { %749 = vmatpush1.bf16.msra.mxu0 %v2191_v18  ;;  %2117 = vmatpush1.bf16.msra.mxu1 %v2191_v18  ;;  %2224 = vpow2.f32 %v1915_v46  ;;  %v2863_v57 = vld [vmem:[%s2739_s10 + $0x90] sm:$0xff]  ;;  %v2866_v58 = vld [vmem:[%s2739_s10 + $0x98] sm:$0xff]  ;;  %v2880_v8 = vld [vmem:[%s2739_s10 + $0xa8] sm:$0xff]  ;;  %v1918_v14 = vmul.f32 -1.442695, %v2872_v62 }
  0x7f   : > { %750 = vmatprep.subr.bf16.mxu0 %v2192_v19  ;;  %2110 = vmatprep.subr.bf16.mxu1 %v2192_v19  ;;  %2226 = vpow2.f32 %v1916_v47  ;;  %v2884_v11 = vld [vmem:[%s2746_s19 + $0x50] sm:$0xff]  ;;  %v2891_v18 = vld [vmem:[%s2739_s10 + $0xb8] sm:$0xff]  ;;  %v2900_v33 = vld [vmem:[%s2746_s19 + $0x60] sm:$0xff] }
  0x80   : > { %951 = vadd.xlane.f32.xlu0 %v2791_v16  ;;  %953 = vadd.xlane.f32.xlu1 %v2794_v17  ;;  %v2888_v15 = vld [vmem:[%s2739_s10 + $0xb0] sm:$0xff]  ;;  %v2896_v25 = vld [vmem:[%s2746_s19 + $0x58] sm:$0xff]  ;;  %v2908_v46 = vld [vmem:[%s2739_s10 + $0xc0] sm:$0xff] }
  0x81   : > { %v1920_v37 = vmul.f32 -1.442695, %v2896_v25  ;;  %v2911_v47 = vld [vmem:[%s2739_s10 + $0xc8] sm:$0xff] }
  0x82   : > { %751 = vmatpush1.bf16.msra.mxu0 %v2194_v24  ;;  %2118 = vmatpush1.bf16.msra.mxu1 %v2194_v24  ;;  %v2213_v50 = vpop.eup %2212  ;;  %3683 = vst [vmem:[#allocation10_spill] sm:$0xff] %v2911_v47 }
  0x83   : > { %752 = vmatprep.subr.bf16.mxu0 %v2195_v27  ;;  %2111 = vmatprep.subr.bf16.mxu1 %v2195_v27  ;;  %v2215_v52 = vpop.eup %2214  ;;  %v490_v53 = vadd.f32 1.0, %v2213_v50  ;;  %v1919_v27 = vmul.f32 -1.442695, %v2884_v11 }
  0x84   : > { %955 = vadd.xlane.f32.xlu0 %v2799_v20  ;;  %957 = vadd.xlane.f32.xlu1 %v2802_v21  ;;  %v2217_v54 = vpop.eup %2216  ;;  %v491_v55 = vadd.f32 1.0, %v2215_v52 }
  0x85   : > { %v2219_v56 = vpop.eup %2218  ;;  %2228 = vrcp.f32 %v490_v53  ;;  %v492_v59 = vadd.f32 1.0, %v2217_v54  ;;  %v2917_v54 = vld [vmem:[%s2746_s19 + $0xc0] sm:$0xff] }
  0x86   : > { %753 = vmatpush1.bf16.msra.mxu0 %v2197_v35  ;;  %2119 = vmatpush1.bf16.msra.mxu1 %v2197_v35  ;;  %2230 = vrcp.f32 %v491_v55  ;;  %v493_v60 = vadd.f32 1.0, %v2219_v56  ;;  %v2221_v63 = vpop.eup %2220 }
  0x87   : > { %754 = vmatprep.subr.bf16.mxu0 %v2198_v38  ;;  %2112 = vmatprep.subr.bf16.mxu1 %v2198_v38  ;;  %2232 = vrcp.f32 %v492_v59  ;;  %v2223_v6 = vpop.eup %2222  ;;  %v494_v19 = vadd.f32 1.0, %v2221_v63  ;;  %v2925_v59 = vld [vmem:[%s2739_s10 + $0xd8] sm:$0xff] }
  0x88   : > { %959 = vadd.xlane.f32.xlu0 %v2822_v31  ;;  %961 = vadd.xlane.f32.xlu1 %v2825_v32  ;;  %2234 = vrcp.f32 %v493_v60  ;;  %v495_v24 = vadd.f32 1.0, %v2223_v6  ;;  %v2225_v26 = vpop.eup %2224  ;;  %3685 = vst [vmem:[#allocation12_spill] sm:$0xff] %v2925_v59  ;;  %v2928_v60 = vld [vmem:[%s2746_s19 + $0xc8] sm:$0xff]  ;;  %v1933_v6 = vmul.f32 -1.442695, %v2917_v54 }
  0x89   : > { %2236 = vpow2.f32 %v1917_v10  ;;  %v2227_v30 = vpop.eup %2226 }
  0x8a   : > { %755 = vmatpush1.bf16.msra.mxu0 %v2200_v44  ;;  %2120 = vmatpush1.bf16.msra.mxu1 %v2200_v44  ;;  %2238 = vpow2.f32 %v1918_v14  ;;  %v497_v53 = vadd.f32 1.0, %v2227_v30 }
  0x8b   : > { %756 = vmatprep.subr.bf16.mxu0 %v2201_v45  ;;  %2113 = vmatprep.subr.bf16.mxu1 %v2201_v45  ;;  %2240 = vrcp.f32 %v494_v19 }
  0x8c   : > { %963 = vadd.xlane.f32.xlu0 %v2842_v41  ;;  %965 = vadd.xlane.f32.xlu1 %v2845_v42  ;;  %2242 = vrcp.f32 %v495_v24  ;;  %v2939_v24 = vld [vmem:[%s2739_s10 + $0xe0] sm:$0xff] }
  0x8d   : > { %2244 = vpow2.f32 %v1919_v27  ;;  %3686 = vst [vmem:[#allocation13_spill] sm:$0xff] %v2939_v24 }
  0x8e   : > { %757 = vmatpush1.bf16.msra.mxu0 %v2203_v51  ;;  %2121 = vmatpush1.bf16.msra.mxu1 %v2203_v51  ;;  %v1921_v51 = vmul.f32 -1.442695, %v2900_v33  ;;  %2246 = vpow2.f32 %v1920_v37 }
  0x8f   : > { %v2229_v35 = vpop.eup %2228 }
  0x90   : > { %967 = vadd.xlane.f32.xlu0 %v2855_v48  ;;  %969 = vadd.xlane.f32.xlu1 %v2858_v49  ;;  %v2231_v38 = vpop.eup %2230  ;;  %v586_v39 = vmul.f32 %v2229_v35, %v2805_v22  ;;  %v496_v22 = vadd.f32 1.0, %v2225_v26  ;;  %2248 = vpow2.f32 %v1921_v51  ;;  %v2942_v26 = vld [vmem:[%s2739_s10 + $0xe8] sm:$0xff]  ;;  %v2953_v51 = vld [vmem:[%s2739_s10 + $0xf8] sm:$0xff] }
  0x91   : > { %v2233_v44 = vpop.eup %2232  ;;  %v587_v45 = vmul.f32 %v2231_v38, %v2808_v23  ;;  %v2920_v23 = vld [vmem:[%s2739_s10 + $0xd0] sm:$0xff]  ;;  %3687 = vst [vmem:[#allocation14_spill] sm:$0xff] %v2942_v26  ;;  %3689 = vst [vmem:[#allocation16_spill] sm:$0xff] %v2953_v51 }
  0x92   : > { %v2235_v50 = vpop.eup %2234  ;;  %3684 = vst [vmem:[#allocation11_spill] sm:$0xff] %v2920_v23  ;;  %v588_v55 = vmul.f32 %v2233_v44, %v2813_v28  ;;  %2250 = vrcp.f32 %v496_v22  ;;  %v2935_v28 = vld [vmem:[%s2746_s19 + $0x68] sm:$0xff]  ;;  %v2948_v44 = vld [vmem:[%s2739_s10 + $0xf0] sm:$0xff] }
  0x93   : > { %v618_v52 = vpack.c.bf16 %v587_v45, %v586_v39  ;;  %v589_v56 = vmul.f32 %v2235_v50, %v2818_v29  ;;  %v2237_v63 = vpop.eup %2236  ;;  %2252 = vrcp.f32 %v497_v53  ;;  %v1934_v29 = vmul.f32 -1.442695, %v2928_v60  ;;  %3688 = vst [vmem:[#allocation15_spill] sm:$0xff] %v2948_v44  ;;  %v2960_v53 = vld [vmem:[%s2746_s19 + $0x78] sm:$0xff] }
  0x94   : > { %971 = vadd.xlane.f32.xlu0 %v2863_v57  ;;  %973 = vadd.xlane.f32.xlu1 %v2866_v58  ;;  %v2239_v10 = vpop.eup %2238  ;;  %v498_v30 = vadd.f32 1.0, %v2237_v63  ;;  %v1922_v35 = vmul.f32 -1.442695, %v2935_v28  ;;  %2254 = vpow2.f32 %v1933_v6 }
  0x95   : > { %775 = vmatmul.mubr.bf16.vlgmr.msra.gmra.mrb[0].mxu0 %v618_v52  ;;  %v2241_v14 = vpop.eup %2240  ;;  %v619_v19 = vpack.c.bf16 %v589_v56, %v588_v55  ;;  %v499_v38 = vadd.f32 1.0, %v2239_v10  ;;  %2256 = vpow2.f32 %v1934_v29  ;;  %v2957_v52 = vld [vmem:[%s2746_s19 + $0x70] sm:$0xff]  ;;  %v1924_v10 = vmul.f32 -1.442695, %v2960_v53 }
  0x96   : > { %784 = vmatprep.mubr.bf16.mxu0 %v3653_v0  ;;  %v2243_v27 = vpop.eup %2242  ;;  %v590_v45 = vmul.f32 %v2241_v14, %v2829_v34  ;;  %2258 = vrcp.f32 %v498_v30  ;;  %v1923_v63 = vmul.f32 -1.442695, %v2957_v52  ;;  %v2967_v14 = vld [vmem:[%s2746_s19 + $0x80] sm:$0xff] }
  0x97   : > { %v2245_v37 = vpop.eup %2244  ;;  %v591_v50 = vmul.f32 %v2243_v27, %v2832_v36  ;;  %2260 = vpow2.f32 %v1922_v35 }
  0x98   : > { %975 = vadd.xlane.f32.xlu0 %v2877_v5  ;;  %977 = vadd.xlane.f32.xlu1 %v2880_v8  ;;  %v2247_v39 = vpop.eup %2246  ;;  %v500_v22 = vadd.f32 1.0, %v2245_v37  ;;  %2262 = vrcp.f32 %v499_v38  ;;  %v2975_v37 = vld [vmem:[%s2746_s19 + $0x88] sm:$0xff] }
  0x99   : > { %v501_v34 = vadd.f32 1.0, %v2247_v39  ;;  %v620_v56 = vpack.c.bf16 %v591_v50, %v590_v45  ;;  %v1925_v39 = vmul.f32 -1.442695, %v2967_v14  ;;  %v2980_v50 = vld [vmem:[%s2746_s19 + $0xd8] sm:$0xff] }
  0x9a   : > { %v2249_v55 = vpop.eup %2248  ;;  %2264 = vrcp.f32 %v500_v22 }
  0x9b   : > { %v502_v29 = vadd.f32 1.0, %v2249_v55  ;;  %2266 = vrcp.f32 %v501_v34  ;;  %v2984_v55 = vld [vmem:[%s2746_s19 + $0xe0] sm:$0xff]  ;;  %v1926_v34 = vmul.f32 -1.442695, %v2975_v37 }
  0x9c   : > { %979 = vadd.xlane.f32.xlu0 %v2888_v15  ;;  %981 = vadd.xlane.f32.xlu1 %v2891_v18  ;;  %v2251_v36 = vpop.eup %2250  ;;  %2268 = vpow2.f32 %v1923_v63 }
  0x9d   : > { %785 = vmatmul.mubr.bf16.gmra.mrb[4].mxu0 %v619_v19  ;;  %v2253_v6 = vpop.eup %2252  ;;  %v2970_v19 = vld [vmem:[%s2746_s19 + $0xd0] sm:$0xff]  ;;  %v592_v30 = vmul.f32 %v2251_v36, %v2839_v40  ;;  %2270 = vpow2.f32 %v1924_v10  ;;  %v2988_v36 = vld [vmem:[%s2746_s19 + $0xe8] sm:$0xff] }
  0x9e   : > { %794 = vmatprep.mubr.bf16.mxu0 %v3653_v0  ;;  %v2255_v27 = vpop.eup %2254  ;;  %v593_v35 = vmul.f32 %v2253_v6, %v2848_v43  ;;  %2272 = vrcp.f32 %v502_v29  ;;  %v1935_v40 = vmul.f32 -1.442695, %v2970_v19  ;;  %v1936_v6 = vmul.f32 -1.442695, %v2980_v50 }
  0x9f   : > { %v2257_v38 = vpop.eup %2256  ;;  %v514_v45 = vadd.f32 1.0, %v2255_v27  ;;  %v1937_v29 = vmul.f32 -1.442695, %v2984_v55  ;;  %v1938_v27 = vmul.f32 -1.442695, %v2988_v36 }
  0xa0   : > { %983 = vadd.xlane.f32.xlu0 %v2908_v46  ;;  %985 = vadd.xlane.f32.xlu1 %v2911_v47  ;;  %v515_v22 = vadd.f32 1.0, %v2257_v38  ;;  %v2259_v43 = vpop.eup %2258  ;;  %v621_v63 = vpack.c.bf16 %v593_v35, %v592_v30  ;;  %v2994_v38 = vld [vmem:[%s2746_s19 + $0xf0] sm:$0xff] }
  0xa1   : > { %2274 = vrcp.f32 %v514_v45  ;;  %v2997_v45 = vld [vmem:[%s2746_s19 + $0xf8] sm:$0xff]  ;;  %v594_v30 = vmul.f32 %v2259_v43, %v2869_v61 }
  0xa2   : > { %2276 = vrcp.f32 %v515_v22  ;;  %v3002_v22 = vld [vmem:[%s2746_s19 + $0x90] sm:$0xff] }
  0xa3   : > { %2278 = vpow2.f32 %v1925_v39  ;;  %v1927_v61 = vmul.f32 -1.442695, %v3002_v22 }
  0xa4   : > { %987 = vadd.xlane.f32.xlu0 %v2920_v23  ;;  %989 = vadd.xlane.f32.xlu1 %v2925_v59  ;;  %2280 = vpow2.f32 %v1935_v40  ;;  %v3006_v40 = vld [vmem:[%s2746_s19 + $0x98] sm:$0xff] }
  0xa5   : > { %795 = vmatmul.mubr.bf16.gmra.mrb[8].mxu0 %v620_v56  ;;  %v2261_v56 = vpop.eup %2260  ;;  %2282 = vpow2.f32 %v1926_v34 }
  0xa6   : > { %804 = vmatprep.mubr.bf16.mxu0 %v3653_v0  ;;  %v2263_v10 = vpop.eup %2262  ;;  %v503_v0 = vadd.f32 1.0, %v2261_v56  ;;  %2284 = vpow2.f32 %v1936_v6  ;;  %v1939_v56 = vmul.f32 -1.442695, %v2994_v38  ;;  %v1928_v6 = vmul.f32 -1.442695, %v3006_v40 }
  0xa7   : > { %v595_v35 = vmul.f32 %v2263_v10, %v2872_v62  ;;  %2286 = vpow2.f32 %v1937_v29 }
  0xa8   : > { %991 = vadd.xlane.f32.xlu0 %v2939_v24  ;;  %993 = vadd.xlane.f32.xlu1 %v2942_v26  ;;  %2288 = vpow2.f32 %v1938_v27  ;;  %v1940_v26 = vmul.f32 -1.442695, %v2997_v45 }
  0xa9   : > { %2290 = vrcp.f32 %v503_v0  ;;  %v622_v43 = vpack.c.bf16 %v595_v35, %v594_v30 }
  0xaa   : > { %2292 = vpow2.f32 %v1939_v56  ;;  %v3018_v56 = vld [vmem:[%s2746_s19 + $0xa0] sm:$0xff] }
  0xab   : > { %2294 = vpow2.f32 %v1940_v26 }
  0xac   : > { %995 = vadd.xlane.f32.xlu0 %v2948_v44  ;;  %997 = vadd.xlane.f32.xlu1 %v2953_v51  ;;  %v2265_v51 = vpop.eup %2264  ;;  %v3690_v44 = vmov 0   ;;  %2296 = vpow2.f32 %v1927_v61  ;;  %v3021_v61 = vld [vmem:[%s2746_s19 + $0xa8] sm:$0xff] }
  0xad   : > { %805 = vmatmul.mubr.bf16.gmra.mrb[12].mxu0 %v621_v63  ;;  %v2267_v39 = vpop.eup %2266  ;;  %v596_v30 = vmul.f32 %v2265_v51, %v2884_v11  ;;  %2298 = vpow2.f32 %v1928_v6 }
  0xae   : > { %814 = vmatprep.mubr.bf16.mxu0 %v3690_v44  ;;  %v2269_v34 = vpop.eup %2268  ;;  %v597_v35 = vmul.f32 %v2267_v39, %v2896_v25  ;;  %v1929_v25 = vmul.f32 -1.442695, %v3018_v56 }
  0xaf   : > { %v2271_v63 = vpop.eup %2270  ;;  %v504_v24 = vadd.f32 1.0, %v2269_v34 }
  0xb0   : > { %v2273_v62 = vpop.eup %2272  ;;  %v505_v29 = vadd.f32 1.0, %v2271_v63  ;;  %v623_v51 = vpack.c.bf16 %v597_v35, %v596_v30 }
  0xb1   : > { %v2275_v10 = vpop.eup %2274  ;;  %2300 = vrcp.f32 %v504_v24 }
  0xb2   : > { %v2277_v59 = vpop.eup %2276  ;;  %v610_v23 = vmul.f32 %v2275_v10, %v2917_v54  ;;  %2302 = vrcp.f32 %v505_v29 }
  0xb3   : > { %v2279_v27 = vpop.eup %2278  ;;  %v611_v0 = vmul.f32 %v2277_v59, %v2928_v60 }
  0xb4   : > { %v2281_v47 = vpop.eup %2280 }
  0xb5   : > { %815 = vmatmul.mubr.bf16.gmra.mrb[16].mxu0 %v622_v43  ;;  %v2283_v34 = vpop.eup %2282  ;;  %v630_v54 = vpack.c.bf16 %v611_v0, %v610_v23  ;;  %v516_v26 = vadd.f32 1.0, %v2281_v47  ;;  %v1930_v43 = vmul.f32 -1.442695, %v3021_v61  ;;  %v506_v23 = vadd.f32 1.0, %v2279_v27  ;;  %v3033_v27 = vld [vmem:[%s2746_s19 + $0xb8] sm:$0xff] }
  0xb6   : > { %824 = vmatprep.mubr.bf16.mxu0 %v3690_v44  ;;  %v2285_v63 = vpop.eup %2284  ;;  %v507_v10 = vadd.f32 1.0, %v2283_v34  ;;  %v598_v0 = vmul.f32 %v2273_v62, %v2900_v33  ;;  %v1932_v62 = vmul.f32 -1.442695, %v3033_v27 }
  0xb7   : > { %v2287_v59 = vpop.eup %2286  ;;  %895 = vmatmul.mubr.bf16.vlgmr.msra.gmra.mrb[0].mxu1 %v630_v54  ;;  %v517_v60 = vadd.f32 1.0, %v2285_v63  ;;  %2304 = vrcp.f32 %v516_v26  ;;  %v3030_v54 = vld [vmem:[%s2746_s19 + $0xb0] sm:$0xff]  ;;  %s1907_s19 = sshll.u32 %s2596_s25, 5 }
  0xb8   : > { %v2289_v11 = vpop.eup %2288  ;;  %904 = vmatprep.mubr.bf16.mxu1 %v3690_v44  ;;  %v518_v39 = vadd.f32 1.0, %v2287_v59  ;;  %v1931_v33 = vmul.f32 -1.442695, %v3030_v54  ;;  %p324_p8 = scmp.lt.s32.totalorder %s1907_s19, 63 }
  0xb9   : > { %v2291_v24 = vpop.eup %2290  ;;  %2306 = vrcp.f32 %v517_v60  ;;  %v519_v47 = vadd.f32 1.0, %v2289_v11 }
  0xba   : > { %2308 = vrcp.f32 %v518_v39  ;;  %v2293_v6 = vpop.eup %2292  ;;  %v599_v30 = vmul.f32 %v2291_v24, %v2935_v28  ;;  %s3735_s19 = smov (!%p324_p8, %s1907_s19), 63 }
  0xbb   : > { %2310 = vrcp.f32 %v519_v47  ;;  %v2295_v29 = vpop.eup %2294  ;;  %v520_v63 = vadd.f32 1.0, %v2293_v6  ;;  %s1908_s17 = sshll.u32 %s3735_s19, 2 }
  0xbc   : > { %2312 = vpow2.f32 %v1929_v25  ;;  %v2297_v35 = vpop.eup %2296  ;;  %v521_v59 = vadd.f32 1.0, %v2295_v29  ;;  %v624_v11 = vpack.c.bf16 %v599_v30, %v598_v0  ;;  %s3531_s9 = scalar_lea.vmem %s3647_s6, %s1908_s17 }
  0xbd   : > { %825 = vmatmul.mubr.bf16.gmra.mrb[20].mxu0 %v623_v51  ;;  %2314 = vpow2.f32 %v1930_v43  ;;  %v2299_v26 = vpop.eup %2298  ;;  %v508_v51 = vadd.f32 1.0, %v2297_v35 }
  0xbe   : > { %834 = vmatprep.mubr.bf16.mxu0 %v3690_v44  ;;  %2316 = vrcp.f32 %v506_v23  ;;  %v2301_v34 = vpop.eup %2300  ;;  %v509_v24 = vadd.f32 1.0, %v2299_v26 }
  0xbf   : > { %2318 = vrcp.f32 %v507_v10  ;;  %v2303_v60 = vpop.eup %2302  ;;  %v600_v47 = vmul.f32 %v2301_v34, %v2957_v52 }
  0xc0   : > { %2320 = vrcp.f32 %v520_v63  ;;  %v601_v23 = vmul.f32 %v2303_v60, %v2960_v53 }
  0xc1   : > { %v2305_v28 = vpop.eup %2304  ;;  %2322 = vrcp.f32 %v521_v59 }
  0xc2   : > { %v612_v25 = vmul.f32 %v2305_v28, %v2970_v19  ;;  %2324 = vpow2.f32 %v1931_v33  ;;  %v625_v35 = vpack.c.bf16 %v601_v23, %v600_v47 }
  0xc3   : > { %v2307_v39 = vpop.eup %2306  ;;  %2326 = vpow2.f32 %v1932_v62 }
  0xc4   : > { %v2309_v43 = vpop.eup %2308  ;;  %v613_v6 = vmul.f32 %v2307_v39, %v2980_v50  ;;  %2328 = vrcp.f32 %v508_v51 }
  0xc5   : > { %835 = vmatmul.mubr.bf16.gmra.mrb[24].mxu0 %v624_v11  ;;  %v2311_v10 = vpop.eup %2310  ;;  %2330 = vrcp.f32 %v509_v24  ;;  %v614_v26 = vmul.f32 %v2309_v43, %v2984_v55 }
  0xc6   : > { %844 = vmatprep.mubr.bf16.mxu0 %v3690_v44  ;;  %v2313_v29 = vpop.eup %2312  ;;  %v631_v19 = vpack.c.bf16 %v613_v6, %v612_v25  ;;  %v615_v52 = vmul.f32 %v2311_v10, %v2988_v36 }
  0xc7   : > { %v2315_v0 = vpop.eup %2314  ;;  %v510_v50 = vadd.f32 1.0, %v2313_v29 }
  0xc8   : > { %v2317_v30 = vpop.eup %2316  ;;  %905 = vmatmul.mubr.bf16.gmra.mrb[4].mxu1 %v631_v19  ;;  %v511_v63 = vadd.f32 1.0, %v2315_v0  ;;  %v632_v11 = vpack.c.bf16 %v615_v52, %v614_v26 }
  0xc9   : > { %v2319_v53 = vpop.eup %2318  ;;  %914 = vmatprep.mubr.bf16.mxu1 %v3690_v44  ;;  %v602_v59 = vmul.f32 %v2317_v30, %v2967_v14  ;;  %2332 = vrcp.f32 %v510_v50 }
  0xca   : > { %v2321_v34 = vpop.eup %2320  ;;  %v603_v60 = vmul.f32 %v2319_v53, %v2975_v37  ;;  %2334 = vrcp.f32 %v511_v63 }
  0xcb   : > { %v2323_v33 = vpop.eup %2322  ;;  %v616_v51 = vmul.f32 %v2321_v34, %v2994_v38 }
  0xcc   : > { %v2325_v28 = vpop.eup %2324  ;;  %v626_v62 = vpack.c.bf16 %v603_v60, %v602_v59  ;;  %v617_v25 = vmul.f32 %v2323_v33, %v2997_v45 }
  0xcd   : > { %845 = vmatmul.mubr.bf16.gmra.mrb[28].mxu0 %v625_v35  ;;  %v2327_v55 = vpop.eup %2326  ;;  %v512_v14 = vadd.f32 1.0, %v2325_v28 }
  0xce   : > { %854 = vmatprep.mubr.bf16.mxu0 %v3690_v44  ;;  %v2329_v36 = vpop.eup %2328  ;;  %v513_v37 = vadd.f32 1.0, %v2327_v55  ;;  %v633_v47 = vpack.c.bf16 %v617_v25, %v616_v51 }
  0xcf   : > { %v2331_v39 = vpop.eup %2330  ;;  %v604_v24 = vmul.f32 %v2329_v36, %v3002_v22  ;;  %2336 = vrcp.f32 %v512_v14 }
  0xd0   : > { %915 = vmatmul.mubr.bf16.gmra.mrb[8].mxu1 %v632_v11  ;;  %v605_v43 = vmul.f32 %v2331_v39, %v3006_v40  ;;  %2338 = vrcp.f32 %v513_v37 }
  0xd1   : > { %924 = vmatprep.mubr.bf16.mxu1 %v3690_v44 }
  0xd2   : > { %v627_v6 = vpack.c.bf16 %v605_v43, %v604_v24 }
  0xd3   : > { %v2333_v23 = vpop.eup %2332 }
  0xd4   : > { %v2335_v38 = vpop.eup %2334  ;;  %v606_v45 = vmul.f32 %v2333_v23, %v3018_v56 }
  0xd5   : > { %855 = vmatmul.mubr.bf16.gmra.mrb[32].mxu0 %v626_v62  ;;  %v607_v10 = vmul.f32 %v2335_v38, %v3021_v61 }
  0xd6   : > { %864 = vmatprep.mubr.bf16.mxu0 %v3690_v44 }
  0xd7   : > { %v628_v22 = vpack.c.bf16 %v607_v10, %v606_v45 }
  0xd8   : > { %925 = vmatmul.mubr.bf16.gmra.mrb[12].mxu1 %v633_v47 }
  0xd9   : > { %v2337_v29 = vpop.eup %2336 }
  0xda   : > { %v2339_v19 = vpop.eup %2338  ;;  %v608_v40 = vmul.f32 %v2337_v29, %v3030_v54 }
  0xdb   : > { %v609_v0 = vmul.f32 %v2339_v19, %v3033_v27 }
  0xdd   : > { %865 = vmatmul.mubr.bf16.gmra.mrb[36].mxu0 %v627_v6  ;;  %v629_v30 = vpack.c.bf16 %v609_v0, %v608_v40 }
  0xde   : > { %874 = vmatprep.mubr.bf16.mxu0 %v3690_v44 }
  0xe5   : > { %875 = vmatmul.mubr.bf16.gmra.mrb[40].mxu0 %v628_v22 }
  0xe6   : > { %884 = vmatprep.mubr.bf16.mxu0 %v3690_v44 }
  0xed   : > { %885 = vmatmul.mubr.bf16.gmra.mrb[44].mxu0 %v629_v30 }
  0xfd   : > { %v936_v35 = vpop.xlane.xlu0 %935  ;;  %v940_v26 = vpop.xlane.xlu1 %939 }
  0xfe   : > { %v1000_v52 = vmul.f32 0.0078125, %v936_v35  ;;  %v1002_v56 = vmul.f32 0.0078125, %v940_v26 }
 0x100   : > { %v3061_v61 = vsub.f32 %v2759_v1, %v1000_v52  ;;  %v3064_v53 = vsub.f32 %v2762_v2, %v1002_v56 }
 0x101   : > { %v938_v50 = vpop.xlane.xlu0 %937  ;;  %v942_v63 = vpop.xlane.xlu1 %941 }
 0x102   : > { %v1001_v34 = vmul.f32 0.0078125, %v938_v50  ;;  %v1064_v54 = vmul.f32 %v3061_v61, %v3061_v61  ;;  %v1003_v27 = vmul.f32 0.0078125, %v942_v63  ;;  %v1066_v1 = vmul.f32 %v3064_v53, %v3064_v53 }
 0x104   : > { %v3069_v44 = vsub.f32 %v2767_v3, %v1001_v34  ;;  %1096 = vadd.xlane.f32.xlu0 %v1064_v54  ;;  %v3072_v59 = vsub.f32 %v2770_v4, %v1003_v27 }
 0x105   : > { %v944_v60 = vpop.xlane.xlu0 %943  ;;  %v946_v2 = vpop.xlane.xlu1 %945 }
 0x106   : > { %v1004_v11 = vmul.f32 0.0078125, %v944_v60  ;;  %v1065_v33 = vmul.f32 %v3069_v44, %v3069_v44  ;;  %v1005_v28 = vmul.f32 0.0078125, %v946_v2  ;;  %v1067_v4 = vmul.f32 %v3072_v59, %v3072_v59 }
 0x108   : > { %v3079_v55 = vsub.f32 %v2775_v7, %v1004_v11  ;;  %1100 = vadd.xlane.f32.xlu0 %v1066_v1  ;;  %1098 = vadd.xlane.f32.xlu1 %v1065_v33  ;;  %v3082_v3 = vsub.f32 %v2778_v9, %v1005_v28 }
 0x109   : > { %v948_v36 = vpop.xlane.xlu0 %947  ;;  %v950_v62 = vpop.xlane.xlu1 %949 }
 0x10a   : > { %v1006_v51 = vmul.f32 0.0078125, %v948_v36  ;;  %v1068_v25 = vmul.f32 %v3079_v55, %v3079_v55  ;;  %v1007_v39 = vmul.f32 0.0078125, %v950_v62  ;;  %v1069_v9 = vmul.f32 %v3082_v3, %v3082_v3 }
 0x10c   : > { %v3089_v14 = vsub.f32 %v2783_v12, %v1006_v51  ;;  %1102 = vadd.xlane.f32.xlu1 %v1067_v4  ;;  %1104 = vadd.xlane.f32.xlu0 %v1068_v25  ;;  %v3092_v7 = vsub.f32 %v2786_v13, %v1007_v39 }
 0x10d   : > { %v952_v37 = vpop.xlane.xlu0 %951  ;;  %v954_v24 = vpop.xlane.xlu1 %953 }
 0x10e   : > { %v1008_v43 = vmul.f32 0.0078125, %v952_v37  ;;  %v1070_v47 = vmul.f32 %v3089_v14, %v3089_v14  ;;  %v1009_v23 = vmul.f32 0.0078125, %v954_v24  ;;  %v1071_v13 = vmul.f32 %v3092_v7, %v3092_v7 }
 0x110   : > { %v3099_v6 = vsub.f32 %v2791_v16, %v1008_v43  ;;  %1106 = vadd.xlane.f32.xlu1 %v1069_v9  ;;  %1108 = vadd.xlane.f32.xlu0 %v1070_v47  ;;  %v3102_v12 = vsub.f32 %v2794_v17, %v1009_v23  ;;  %v2204_v16 = vld [vmem:[%s3645_s4] sm:$0xff]  }
 0x111   : > { %v956_v38 = vpop.xlane.xlu0 %955  ;;  %v958_v45 = vpop.xlane.xlu1 %957  ;;  %2058 = vmatprep.subr.bf16.mxu1 %v2204_v16 }
 0x112   : > { %v1010_v10 = vmul.f32 0.0078125, %v956_v38  ;;  %v1072_v29 = vmul.f32 %v3099_v6, %v3099_v6  ;;  %v1011_v22 = vmul.f32 0.0078125, %v958_v45  ;;  %v1073_v40 = vmul.f32 %v3102_v12, %v3102_v12  ;;  %2059 = vmatpush3.bf16.msra.mxu1 %v2204_v16 }
 0x114   : > { %v3112_v19 = vsub.f32 %v2799_v20, %v1010_v10  ;;  %1110 = vadd.xlane.f32.xlu1 %v1071_v13  ;;  %1112 = vadd.xlane.f32.xlu0 %v1072_v29  ;;  %v3115_v17 = vsub.f32 %v2802_v21, %v1011_v22  ;;  %v2205_v20 = vld [vmem:[%s3645_s4 + $0x8] sm:$0xff]  }
 0x115   : > { %v960_v0 = vpop.xlane.xlu0 %959  ;;  %v962_v30 = vpop.xlane.xlu1 %961  ;;  %2060 = vmatprep.subr.bf16.mxu1 %v2205_v20 }
 0x116   : > { %v1012_v35 = vmul.f32 0.0078125, %v960_v0  ;;  %v1074_v26 = vmul.f32 %v3112_v19, %v3112_v19  ;;  %v1013_v52 = vmul.f32 0.0078125, %v962_v30  ;;  %v1075_v50 = vmul.f32 %v3115_v17, %v3115_v17  ;;  %2061 = vmatpush3.bf16.msra.mxu1 %v2205_v20 }
 0x118   : > { %v3125_v56 = vsub.f32 %v2822_v31, %v1012_v35  ;;  %1114 = vadd.xlane.f32.xlu1 %v1073_v40  ;;  %1116 = vadd.xlane.f32.xlu0 %v1074_v26  ;;  %v3128_v21 = vsub.f32 %v2825_v32, %v1013_v52  ;;  %v2206_v31 = vld [vmem:[%s3645_s4 + $0x10] sm:$0xff]  }
 0x119   : > { %v964_v63 = vpop.xlane.xlu0 %963  ;;  %v966_v34 = vpop.xlane.xlu1 %965  ;;  %2062 = vmatprep.subr.bf16.mxu1 %v2206_v31 }
 0x11a   : > { %v1014_v54 = vmul.f32 0.0078125, %v964_v63  ;;  %v1076_v27 = vmul.f32 %v3125_v56, %v3125_v56  ;;  %v1015_v1 = vmul.f32 0.0078125, %v966_v34  ;;  %v1077_v2 = vmul.f32 %v3128_v21, %v3128_v21  ;;  %2063 = vmatpush3.bf16.msra.mxu1 %v2206_v31 }
 0x11c   : > { %v3138_v60 = vsub.f32 %v2842_v41, %v1014_v54  ;;  %1118 = vadd.xlane.f32.xlu1 %v1075_v50  ;;  %1120 = vadd.xlane.f32.xlu0 %v1076_v27  ;;  %v3141_v32 = vsub.f32 %v2845_v42, %v1015_v1  ;;  %v2207_v41 = vld [vmem:[%s3645_s4 + $0x18] sm:$0xff]  }
 0x11d   : > { %v968_v11 = vpop.xlane.xlu0 %967  ;;  %v970_v33 = vpop.xlane.xlu1 %969  ;;  %2064 = vmatprep.subr.bf16.mxu1 %v2207_v41 }
 0x11e   : > { %v1016_v28 = vmul.f32 0.0078125, %v968_v11  ;;  %v1078_v4 = vmul.f32 %v3138_v60, %v3138_v60  ;;  %v1017_v36 = vmul.f32 0.0078125, %v970_v33  ;;  %v1079_v51 = vmul.f32 %v3141_v32, %v3141_v32  ;;  %2065 = vmatpush3.bf16.msra.mxu1 %v2207_v41  ;;  %v3700_v41 = vld [vmem:[#allocation12_spill] sm:$0xff] }
 0x120   : > { %v3151_v62 = vsub.f32 %v2855_v48, %v1016_v28  ;;  %1122 = vadd.xlane.f32.xlu1 %v1077_v2  ;;  %1124 = vadd.xlane.f32.xlu0 %v1078_v4  ;;  %v3154_v42 = vsub.f32 %v2858_v49, %v1017_v36  ;;  %v2208_v48 = vld [vmem:[%s3645_s4 + $0x20] sm:$0xff]   ;;  %v3698_v36 = vld [vmem:[#allocation11_spill] sm:$0xff] }
 0x121   : > { %v972_v25 = vpop.xlane.xlu0 %971  ;;  %v974_v39 = vpop.xlane.xlu1 %973  ;;  %2066 = vmatprep.subr.bf16.mxu1 %v2208_v48 }
 0x122   : > { %v1018_v9 = vmul.f32 0.0078125, %v972_v25  ;;  %v1080_v37 = vmul.f32 %v3151_v62, %v3151_v62  ;;  %v1019_v24 = vmul.f32 0.0078125, %v974_v39  ;;  %v1081_v47 = vmul.f32 %v3154_v42, %v3154_v42  ;;  %2067 = vmatpush3.bf16.msra.mxu1 %v2208_v48 }
 0x124   : > { %v3164_v43 = vsub.f32 %v2863_v57, %v1018_v9  ;;  %1126 = vadd.xlane.f32.xlu1 %v1079_v51  ;;  %1128 = vadd.xlane.f32.xlu0 %v1080_v37  ;;  %v3167_v49 = vsub.f32 %v2866_v58, %v1019_v24  ;;  %v2209_v57 = vld [vmem:[%s3645_s4 + $0x28] sm:$0xff]  }
 0x125   : > { %v976_v23 = vpop.xlane.xlu0 %975  ;;  %v978_v13 = vpop.xlane.xlu1 %977  ;;  %2068 = vmatprep.subr.bf16.mxu1 %v2209_v57 }
 0x126   : > { %v1020_v38 = vmul.f32 0.0078125, %v976_v23  ;;  %v1082_v45 = vmul.f32 %v3164_v43, %v3164_v43  ;;  %v1021_v10 = vmul.f32 0.0078125, %v978_v13  ;;  %v1083_v22 = vmul.f32 %v3167_v49, %v3167_v49  ;;  %2069 = vmatpush3.bf16.msra.mxu1 %v2209_v57  ;;  %v3704_v13 = vld [vmem:[#allocation14_spill] sm:$0xff] }
 0x128   : > { %v3177_v29 = vsub.f32 %v2877_v5, %v1020_v38  ;;  %1130 = vadd.xlane.f32.xlu1 %v1081_v47  ;;  %1132 = vadd.xlane.f32.xlu0 %v1082_v45  ;;  %v3180_v58 = vsub.f32 %v2880_v8, %v1021_v10  ;;  %v2210_v5 = vld [vmem:[%s3645_s4 + $0x30] sm:$0xff]   ;;  %v3702_v47 = vld [vmem:[#allocation13_spill] sm:$0xff] }
 0x129   : > { %v980_v16 = vpop.xlane.xlu0 %979  ;;  %v982_v40 = vpop.xlane.xlu1 %981  ;;  %2070 = vmatprep.subr.bf16.mxu1 %v2210_v5 }
 0x12a   : > { %3691 = vst [vmem:[#allocation17_spill] sm:$0xff] %v3177_v29  ;;  %3692 = vst [vmem:[#allocation18_spill] sm:$0xff] %v3180_v58  ;;  %v1022_v0 = vmul.f32 0.0078125, %v980_v16  ;;  %v1084_v30 = vmul.f32 %v3177_v29, %v3177_v29  ;;  %v1023_v35 = vmul.f32 0.0078125, %v982_v40  ;;  %v1085_v52 = vmul.f32 %v3180_v58, %v3180_v58  ;;  %2071 = vmatpush3.bf16.msra.mxu1 %v2210_v5 }
 0x12c   : > { %v3190_v26 = vsub.f32 %v2888_v15, %v1022_v0  ;;  %1134 = vadd.xlane.f32.xlu1 %v1083_v22  ;;  %1136 = vadd.xlane.f32.xlu0 %v1084_v30  ;;  %v3193_v8 = vsub.f32 %v2891_v18, %v1023_v35  ;;  %v2211_v15 = vld [vmem:[%s3645_s4 + $0x38] sm:$0xff]   ;;  %v3696_v18 = vld [vmem:[#allocation10_spill] sm:$0xff]  ;;  %v3706_v0 = vld [vmem:[#allocation15_spill] sm:$0xff] }
 0x12d   : > { %v984_v20 = vpop.xlane.xlu0 %983  ;;  %v986_v50 = vpop.xlane.xlu1 %985  ;;  %2072 = vmatprep.subr.bf16.mxu1 %v2211_v15  ;;  %v3708_v35 = vld [vmem:[#allocation16_spill] sm:$0xff] }
 0x12e   : > { %3693 = vst [vmem:[#allocation19_spill] sm:$0xff] %v3190_v26  ;;  %3694 = vst [vmem:[#allocation20_spill] sm:$0xff] %v3193_v8  ;;  %v1024_v63 = vmul.f32 0.0078125, %v984_v20  ;;  %v1086_v34 = vmul.f32 %v3190_v26, %v3190_v26  ;;  %v1025_v54 = vmul.f32 0.0078125, %v986_v50  ;;  %v1087_v31 = vmul.f32 %v3193_v8, %v3193_v8  ;;  %2073 = vmatpush3.bf16.msra.mxu1 %v2211_v15 }
 0x130   : > { %v3203_v27 = vsub.f32 %v2908_v46, %v1024_v63  ;;  %1138 = vadd.xlane.f32.xlu1 %v1085_v52  ;;  %1140 = vadd.xlane.f32.xlu0 %v1086_v34  ;;  %v3206_v1 = vsub.f32 %v3696_v18, %v1025_v54 }
 0x131   : > { %v988_v2 = vpop.xlane.xlu0 %987  ;;  %v990_v11 = vpop.xlane.xlu1 %989 }
 0x132   : > { %3695 = vst [vmem:[#allocation21_spill] sm:$0xff] %v3203_v27  ;;  %3697 = vst [vmem:[#allocation10_spill] sm:$0xff] %v3206_v1  ;;  %v1026_v33 = vmul.f32 0.0078125, %v988_v2  ;;  %v1088_v28 = vmul.f32 %v3203_v27, %v3203_v27  ;;  %v1027_v4 = vmul.f32 0.0078125, %v990_v11  ;;  %v1089_v25 = vmul.f32 %v3206_v1, %v3206_v1 }
 0x134   : > { %v3213_v46 = vsub.f32 %v3698_v36, %v1026_v33  ;;  %1142 = vadd.xlane.f32.xlu1 %v1087_v31  ;;  %1144 = vadd.xlane.f32.xlu0 %v1088_v28  ;;  %v3216_v51 = vsub.f32 %v3700_v41, %v1027_v4  ;;  %v652_v4 = vlaneseq }
 0x135   : > { %v992_v39 = vpop.xlane.xlu0 %991  ;;  %v994_v9 = vpop.xlane.xlu1 %993 }
 0x136   : > { %3699 = vst [vmem:[#allocation11_spill] sm:$0xff] %v3213_v46  ;;  %3701 = vst [vmem:[#allocation12_spill] sm:$0xff] %v3216_v51  ;;  %v1028_v37 = vmul.f32 0.0078125, %v992_v39  ;;  %v1090_v24 = vmul.f32 %v3213_v46, %v3213_v46  ;;  %v1029_v48 = vmul.f32 0.0078125, %v994_v9  ;;  %v1091_v45 = vmul.f32 %v3216_v51, %v3216_v51 }
 0x138   : > { %v3223_v23 = vsub.f32 %v3702_v47, %v1028_v37  ;;  %1146 = vadd.xlane.f32.xlu1 %v1089_v25  ;;  %1148 = vadd.xlane.f32.xlu0 %v1090_v24  ;;  %v3226_v38 = vsub.f32 %v3704_v13, %v1029_v48  ;;  %v653_v25 = vshrl.u32 %v652_v4, 7  ;;  %v650_v48 = vld [vmem:[%s3644_s3] sm:$0x3] }
 0x139   : > { %v996_v10 = vpop.xlane.xlu0 %995  ;;  %v998_v57 = vpop.xlane.xlu1 %997 }
 0x13a   : > { %3703 = vst [vmem:[#allocation13_spill] sm:$0xff] %v3223_v23  ;;  %3705 = vst [vmem:[#allocation14_spill] sm:$0xff] %v3226_v38  ;;  %v1030_v22 = vmul.f32 0.0078125, %v996_v10  ;;  %v1092_v16 = vmul.f32 %v3223_v23, %v3223_v23  ;;  %v1031_v40 = vmul.f32 0.0078125, %v998_v57  ;;  %v1093_v52 = vmul.f32 %v3226_v38, %v3226_v38 }
 0x13b   : > { %v658_v37 = vsub.s32 1, %v653_v25  ;;  %v654_v13 = vsub.s32 0, %v653_v25 }
 0x13c   : > { %v3233_v30 = vsub.f32 %v3706_v0, %v1030_v22  ;;  %1150 = vadd.xlane.f32.xlu1 %v1091_v45  ;;  %1152 = vadd.xlane.f32.xlu0 %v1092_v16  ;;  %v3236_v5 = vsub.f32 %v3708_v35, %v1031_v40 }
 0x13d   : > { %v3251_v10 = vrot.slane %v650_v48, %v658_v37  ;;  %v3255_v40 = vrot.slane %v650_v48, %v654_v13 }
 0x13e   : > { %3707 = vst [vmem:[#allocation15_spill] sm:$0xff] %v3233_v30  ;;  %3709 = vst [vmem:[#allocation16_spill] sm:$0xff] %v3236_v5  ;;  %v1094_v20 = vmul.f32 %v3233_v30, %v3233_v30  ;;  %v1095_v50 = vmul.f32 %v3236_v5, %v3236_v5 }
 0x140   : > { %1154 = vadd.xlane.f32.xlu1 %v1093_v52  ;;  %1156 = vadd.xlane.f32.xlu0 %v1094_v20 }
 0x144   : > { %1158 = vadd.xlane.f32.xlu1 %v1095_v50 }
 0x168   : > { %v776_v63 = vpop.f32.mrb[0].mxu0 }
 0x169   : > { %v778_v34 = vpop.f32.mrb[1].mxu0  ;;  %v3267_v13 = vadd.f32 %v776_v63, %v3255_v40 }
 0x16a   : > { %v780_v54 = vpop.f32.mrb[2].mxu0  ;;  %v779_v52 = vadd.f32 %v778_v34, %v3251_v10 }
 0x16b   : > { %v782_v15 = vpop.f32.mrb[3].mxu0  ;;  %v3270_v34 = vadd.f32 %v780_v54, %v3255_v40 }
 0x16c   : > { %v783_v20 = vadd.f32 %v782_v15, %v3251_v10 }
 0x16e   : > { %v3275_v23 = vadd.f32 1.0, %v783_v20 }
 0x170   : > { %v786_v18 = vpop.f32.mrb[4].mxu0 }
 0x171   : > { %v788_v31 = vpop.f32.mrb[5].mxu0  ;;  %v3280_v63 = vadd.f32 %v786_v18, %v3255_v40 }
 0x172   : > { %v790_v2 = vpop.f32.mrb[6].mxu0 }
 0x173   : > { %v792_v11 = vpop.f32.mrb[7].mxu0 }
 0x174   : > { %v793_v15 = vadd.f32 %v792_v11, %v3251_v10 }
 0x178   : > { %v796_v33 = vpop.f32.mrb[8].mxu0 }
 0x179   : > { %v798_v28 = vpop.f32.mrb[9].mxu0  ;;  %v3292_v27 = vadd.f32 %v796_v33, %v3255_v40 }
 0x17a   : > { %v800_v36 = vpop.f32.mrb[10].mxu0  ;;  %v799_v54 = vadd.f32 %v798_v28, %v3251_v10 }
 0x17b   : > { %v802_v41 = vpop.f32.mrb[11].mxu0 }
 0x180   : > { %v3244_v39 = vpop.f32.mrb[12].mxu0 }
 0x181   : > { %v808_v9 = vpop.f32.mrb[13].mxu0 }
 0x182   : > { %v3246_v24 = vpop.f32.mrb[14].mxu0  ;;  %v809_v18 = vadd.f32 %v808_v9, %v3251_v10 }
 0x183   : > { %v812_v47 = vpop.f32.mrb[15].mxu0 }
 0x188   : > { %v3253_v22 = vpop.f32.mrb[16].mxu0 }
 0x189   : > { %v818_v0 = vpop.f32.mrb[17].mxu0 }
 0x18a   : > { %v3259_v50 = vpop.f32.mrb[18].mxu0  ;;  %v3261_v30 = vpop.f32.mrb[0].mxu1 }
 0x18b   : > { %v822_v5 = vpop.f32.mrb[19].mxu0  ;;  %3710 = vst [vmem:[#allocation22_spill] sm:$0xff] %v3261_v30  ;;  %v3264_v48 = vpop.f32.mrb[1].mxu1 }
 0x18c   : > { %v3273_v38 = vpop.f32.mrb[2].mxu1 }
 0x18d   : > { %3711 = vst [vmem:[#allocation23_spill] sm:$0xff] %v3273_v38  ;;  %v3277_v51 = vpop.f32.mrb[3].mxu1 }
 0x190   : > { %v826_v20 = vpop.f32.mrb[20].mxu0 }
 0x191   : > { %v1097_v45 = vpop.xlane.xlu0 %1096  ;;  %v828_v38 = vpop.f32.mrb[21].mxu0 }
 0x192   : > { %v1160_v57 = vmul.f32 0.0078125, %v1097_v45  ;;  %v789_v45 = vadd.f32 %v788_v31, %v3251_v10 }
 0x194   : > { %v1192_v16 = vadd.f32 1e-06, %v1160_v57  ;;  %v3283_v11 = vadd.f32 1.0, %v789_v45  ;;  %v3296_v45 = vadd.f32 %v800_v36, %v3255_v40  ;;  %v823_v36 = vadd.f32 %v822_v5, %v3251_v10 }
 0x195   : > { %v1099_v35 = vpop.xlane.xlu1 %1098  ;;  %v1101_v25 = vpop.xlane.xlu0 %1100 }
 0x196   : > { %2340 = vrsqrt.f32 %v1192_v16  ;;  %v1161_v4 = vmul.f32 0.0078125, %v1099_v35  ;;  %v1162_v37 = vmul.f32 0.0078125, %v1101_v25  ;;  %v1288_v25 = vadd.f32 1.0, %v779_v52 }
 0x197   : > { %v803_v52 = vadd.f32 %v802_v41, %v3251_v10  ;;  %v3328_v58 = vadd.f32 1.0, %v823_v36 }
 0x198   : > { %v1193_v57 = vadd.f32 1e-06, %v1161_v4  ;;  %v1194_v16 = vadd.f32 1e-06, %v1162_v37  ;;  %v3286_v37 = vadd.f32 %v790_v2, %v3255_v40  ;;  %v813_v2 = vadd.f32 %v812_v47, %v3251_v10 }
 0x199   : > { %v1103_v35 = vpop.xlane.xlu1 %1102  ;;  %v1105_v4 = vpop.xlane.xlu0 %1104  ;;  %v3302_v8 = vadd.f32 1.0, %v803_v52  ;;  %v3320_v52 = vadd.f32 %v3253_v22, %v3255_v40  ;;  %v3332_v22 = vadd.f32 %v3264_v48, %v3251_v10  ;;  %v3340_v48 = vadd.f32 %v3277_v51, %v3251_v10 }
 0x19a   : > { %2342 = vrsqrt.f32 %v1193_v57  ;;  %v1163_v31 = vmul.f32 0.0078125, %v1103_v35  ;;  %v1164_v1 = vmul.f32 0.0078125, %v1105_v4  ;;  %v3289_v35 = vadd.f32 1.0, %v793_v15  ;;  %v830_v4 = vpop.f32.mrb[22].mxu0 }
 0x19b   : > { %2344 = vrsqrt.f32 %v1194_v16  ;;  %v819_v15 = vadd.f32 %v818_v0, %v3251_v10  ;;  %v832_v33 = vpop.f32.mrb[23].mxu0  ;;  %3712 = vst [vmem:[#allocation24_spill] sm:$0xff] %v3340_v48 }
 0x19c   : > { %v1195_v57 = vadd.f32 1e-06, %v1163_v31  ;;  %v1196_v28 = vadd.f32 1e-06, %v1164_v1  ;;  %v3299_v31 = vadd.f32 1.0, %v799_v54  ;;  %v3306_v1 = vadd.f32 %v3244_v39, %v3255_v40 }
 0x19d   : > { %v1107_v16 = vpop.xlane.xlu1 %1106  ;;  %v1109_v30 = vpop.xlane.xlu0 %1108  ;;  %v3313_v54 = vadd.f32 %v3246_v24, %v3255_v40 }
 0x19e   : > { %2346 = vrsqrt.f32 %v1195_v57  ;;  %v1165_v41 = vmul.f32 0.0078125, %v1107_v16  ;;  %v1166_v46 = vmul.f32 0.0078125, %v1109_v30  ;;  %v3309_v57 = vadd.f32 1.0, %v809_v18 }
 0x19f   : > { %2348 = vrsqrt.f32 %v1196_v28  ;;  %v3316_v16 = vadd.f32 1.0, %v813_v2  ;;  %v3326_v18 = vadd.f32 %v3259_v50, %v3255_v40 }
 0x1a0   : > { %v2341_v9 = vpop.eup %2340  ;;  %v1197_v47 = vadd.f32 1e-06, %v1165_v41  ;;  %v1198_v0 = vadd.f32 1e-06, %v1166_v46  ;;  %v3322_v41 = vadd.f32 1.0, %v819_v15  ;;  %v829_v15 = vadd.f32 %v828_v38, %v3251_v10 }
 0x1a1   : > { %v1111_v28 = vpop.xlane.xlu1 %1110  ;;  %v1256_v30 = vmul.f32 %v2341_v9, %v3061_v61  ;;  %v1113_v5 = vpop.xlane.xlu0 %1112 }
 0x1a2   : > { %2350 = vrsqrt.f32 %v1197_v47  ;;  %v1167_v39 = vmul.f32 0.0078125, %v1111_v28  ;;  %v1168_v24 = vmul.f32 0.0078125, %v1113_v5  ;;  %v836_v61 = vpop.f32.mrb[24].mxu0  ;;  %v3343_v5 = vadd.f32 %v826_v20, %v3255_v40 }
 0x1a3   : > { %v1320_v46 = vmul.f32 %v1288_v25, %v1256_v30  ;;  %2352 = vrsqrt.f32 %v1198_v0  ;;  %v838_v47 = vpop.f32.mrb[25].mxu0 }
 0x1a4   : > { %v2343_v26 = vpop.eup %2342  ;;  %v1199_v2 = vadd.f32 1e-06, %v1167_v39  ;;  %v1200_v28 = vadd.f32 1e-06, %v1168_v24  ;;  %v840_v0 = vpop.f32.mrb[26].mxu0 }
 0x1a5   : > { %v2345_v9 = vpop.eup %2344  ;;  %v1115_v29 = vpop.xlane.xlu1 %1114  ;;  %v1257_v50 = vmul.f32 %v2343_v26, %v3069_v44  ;;  %v1352_v25 = vadd.f32 %v1320_v46, %v3267_v13 }
 0x1a6   : > { %v1258_v36 = vmul.f32 %v2345_v9, %v3064_v53  ;;  %2354 = vrsqrt.f32 %v1199_v2  ;;  %v1169_v30 = vmul.f32 0.0078125, %v1115_v29  ;;  %v1117_v39 = vpop.xlane.xlu0 %1116  ;;  %v842_v38 = vpop.f32.mrb[27].mxu0  ;;  %v3348_v53 = vadd.f32 %v830_v4, %v3255_v40 }
 0x1a7   : > { %2356 = vrsqrt.f32 %v1200_v28  ;;  %v1170_v24 = vmul.f32 0.0078125, %v1117_v39  ;;  %v1321_v44 = vmul.f32 %v3275_v23, %v1257_v50  ;;  %v833_v29 = vadd.f32 %v832_v33, %v3251_v10  ;;  %v3351_v2 = vpop.f32.mrb[4].mxu1 }
 0x1a8   : > { %v2347_v26 = vpop.eup %2346  ;;  %v1322_v13 = vmul.f32 %v3283_v11, %v1258_v36  ;;  %v1201_v46 = vadd.f32 1e-06, %v1169_v30  ;;  %3713 = vst [vmem:[#allocation25_spill] sm:$0xff] %v3351_v2  ;;  %v3353_v9 = vadd.f32 1.0, %v829_v15  ;;  %v908_v50 = vpop.f32.mrb[5].mxu1  ;;  %v839_v11 = vadd.f32 %v838_v47, %v3251_v10 }
 0x1a9   : > { %v2349_v51 = vpop.eup %2348  ;;  %v1259_v20 = vmul.f32 %v2347_v26, %v3072_v59  ;;  %v1202_v28 = vadd.f32 1e-06, %v1170_v24  ;;  %v1119_v39 = vpop.xlane.xlu1 %1118  ;;  %v1353_v23 = vadd.f32 %v1321_v44, %v3270_v34  ;;  %v843_v15 = vadd.f32 %v842_v38, %v3251_v10 }
 0x1aa   : > { %2358 = vrsqrt.f32 %v1201_v46  ;;  %v1171_v4 = vmul.f32 0.0078125, %v1119_v39  ;;  %v1121_v36 = vpop.xlane.xlu0 %1120  ;;  %v1354_v33 = vadd.f32 %v1322_v13, %v3280_v63  ;;  %v3359_v30 = vpop.f32.mrb[6].mxu1  ;;  %v3365_v34 = vadd.f32 1.0, %v833_v29 }
 0x1ab   : > { %v1323_v48 = vmul.f32 %v3289_v35, %v1259_v20  ;;  %v1172_v2 = vmul.f32 0.0078125, %v1121_v36  ;;  %v1384_v59 = vpack.c.bf16 %v1353_v23, %v1352_v25  ;;  %v3363_v24 = vpop.f32.mrb[7].mxu1  ;;  %2360 = vrsqrt.f32 %v1202_v28  ;;  %v846_v47 = vpop.f32.mrb[28].mxu0 }
 0x1ac   : > { %v2351_v26 = vpop.eup %2350  ;;  %v1203_v44 = vadd.f32 1e-06, %v1171_v4  ;;  %v1260_v46 = vmul.f32 %v2349_v51, %v3079_v55  ;;  %v3369_v63 = vadd.f32 %v836_v61, %v3255_v40  ;;  %v848_v13 = vpop.f32.mrb[29].mxu0  ;;  %v3374_v29 = vadd.f32 %v840_v0, %v3255_v40 }
 0x1ad   : > { %v1204_v39 = vadd.f32 1e-06, %v1172_v2  ;;  %v1123_v35 = vpop.xlane.xlu1 %1122  ;;  %2074 = vmatprep.mubr.bf16.mxu1 %v1384_v59  ;;  %v1355_v38 = vadd.f32 %v1323_v48, %v3286_v37  ;;  %v1261_v25 = vmul.f32 %v2351_v26, %v3082_v3  ;;  %v2353_v20 = vpop.eup %2352  ;;  %v3377_v61 = vadd.f32 1.0, %v839_v11 }
 0x1ae   : > { %2362 = vrsqrt.f32 %v1203_v44  ;;  %v850_v28 = vpop.f32.mrb[30].mxu0  ;;  %v1173_v23 = vmul.f32 0.0078125, %v1123_v35  ;;  %v1125_v4 = vpop.xlane.xlu0 %1124  ;;  %v1324_v55 = vmul.f32 %v3299_v31, %v1260_v46  ;;  %v3379_v51 = vadd.f32 1.0, %v843_v15 }
 0x1af   : > { %v852_v2 = vpop.f32.mrb[31].mxu0  ;;  %v1174_v36 = vmul.f32 0.0078125, %v1125_v4  ;;  %v1385_v59 = vpack.c.bf16 %v1355_v38, %v1354_v33  ;;  %2364 = vrsqrt.f32 %v1204_v39  ;;  %v1325_v48 = vmul.f32 %v3302_v8, %v1261_v25  ;;  %v3385_v26 = vpop.f32.mrb[8].mxu1 }
 0x1b0   : > { %v2355_v37 = vpop.eup %2354  ;;  %v1205_v3 = vadd.f32 1e-06, %v1173_v23  ;;  %v3383_v0 = vadd.f32 %v908_v50, %v3251_v10  ;;  %v1356_v11 = vadd.f32 %v1324_v55, %v3292_v27  ;;  %v1262_v15 = vmul.f32 %v2353_v20, %v3089_v14  ;;  %v3390_v46 = vpop.f32.mrb[9].mxu1 }
 0x1b1   : > { %v2357_v44 = vpop.eup %2356  ;;  %v1206_v35 = vadd.f32 1e-06, %v1174_v36  ;;  %v1127_v31 = vpop.xlane.xlu1 %1126  ;;  %2075 = vmatmul.mubr.bf16.vlgmr.msra.gmra.mrb[16].mxu1 %v1385_v59  ;;  %v1263_v33 = vmul.f32 %v2355_v37, %v3092_v7  ;;  %v849_v39 = vadd.f32 %v848_v13, %v3251_v10  ;;  %v1357_v38 = vadd.f32 %v1325_v48, %v3296_v45 }
 0x1b2   : > { %2366 = vrsqrt.f32 %v1205_v3  ;;  %v1175_v8 = vmul.f32 0.0078125, %v1127_v31  ;;  %v1129_v50 = vpop.xlane.xlu0 %1128  ;;  %v3394_v25 = vpop.f32.mrb[10].mxu1  ;;  %v853_v23 = vadd.f32 %v852_v2, %v3251_v10  ;;  %v1326_v27 = vmul.f32 %v3309_v57, %v1262_v15 }
 0x1b3   : > { %v1176_v4 = vmul.f32 0.0078125, %v1129_v50  ;;  %v1327_v14 = vmul.f32 %v3316_v16, %v1263_v33  ;;  %v3399_v20 = vpop.f32.mrb[11].mxu1  ;;  %2368 = vrsqrt.f32 %v1206_v35  ;;  %v856_v55 = vpop.f32.mrb[32].mxu0  ;;  %v1386_v36 = vpack.c.bf16 %v1357_v38, %v1356_v11 }
 0x1b4   : > { %v2359_v7 = vpop.eup %2358  ;;  %v1207_v13 = vadd.f32 1e-06, %v1175_v8  ;;  %v1264_v59 = vmul.f32 %v2357_v44, %v3099_v6  ;;  %v3403_v45 = vadd.f32 %v846_v47, %v3255_v40  ;;  %v3406_v37 = vadd.f32 %v850_v28, %v3255_v40  ;;  %v858_v2 = vpop.f32.mrb[33].mxu0 }
 0x1b5   : > { %v1131_v3 = vpop.xlane.xlu1 %1130  ;;  %v1358_v57 = vadd.f32 %v1326_v27, %v3306_v1  ;;  %v1359_v16 = vadd.f32 %v1327_v14, %v3313_v54  ;;  %v2361_v48 = vpop.eup %2360  ;;  %v1208_v35 = vadd.f32 1e-06, %v1176_v4  ;;  %2078 = vmatprep.mubr.bf16.mxu1 %v1386_v36  ;;  %v1265_v6 = vmul.f32 %v2359_v7, %v3102_v12 }
 0x1b6   : > { %2370 = vrsqrt.f32 %v1207_v13  ;;  %v860_v31 = vpop.f32.mrb[34].mxu0  ;;  %v1177_v15 = vmul.f32 0.0078125, %v1131_v3  ;;  %v1133_v11 = vpop.xlane.xlu0 %1132  ;;  %v3411_v47 = vadd.f32 1.0, %v849_v39  ;;  %v3413_v44 = vadd.f32 1.0, %v853_v23 }
 0x1b7   : > { %v862_v28 = vpop.f32.mrb[35].mxu0  ;;  %v1178_v33 = vmul.f32 0.0078125, %v1133_v11  ;;  %v1387_v8 = vpack.c.bf16 %v1359_v16, %v1358_v57  ;;  %v3416_v1 = vadd.f32 %v856_v55, %v3255_v40  ;;  %v859_v54 = vadd.f32 %v858_v2, %v3251_v10  ;;  %v3420_v27 = vpop.f32.mrb[12].mxu1 }
 0x1b8   : > { %v2363_v50 = vpop.eup %2362  ;;  %v1209_v38 = vadd.f32 1e-06, %v1177_v15  ;;  %v1328_v4 = vmul.f32 %v3322_v41, %v1264_v59  ;;  %v1329_v39 = vmul.f32 %v3328_v58, %v1265_v6  ;;  %v1266_v23 = vmul.f32 %v2361_v48, %v3112_v19  ;;  %v3425_v13 = vpop.f32.mrb[13].mxu1 }
 0x1b9   : > { %v1210_v14 = vadd.f32 1e-06, %v1178_v33  ;;  %v1135_v12 = vpop.xlane.xlu1 %1134  ;;  %2079 = vmatmul.mubr.bf16.gmra.mrb[20].mxu1 %v1387_v8  ;;  %v1267_v7 = vmul.f32 %v2363_v50, %v3115_v17  ;;  %v2365_v55 = vpop.eup %2364  ;;  %2372 = vrsqrt.f32 %v1208_v35  ;;  %v863_v36 = vadd.f32 %v862_v28, %v3251_v10 }
 0x1ba   : > { %v1179_v2 = vmul.f32 0.0078125, %v1135_v12  ;;  %v1137_v3 = vpop.xlane.xlu0 %1136  ;;  %v1360_v41 = vadd.f32 %v1328_v4, %v3320_v52  ;;  %v3429_v59 = vpop.f32.mrb[14].mxu1  ;;  %v1361_v58 = vadd.f32 %v1329_v39, %v3326_v18  ;;  %v1330_v19 = vmul.f32 %v3353_v9, %v1266_v23 }
 0x1bb   : > { %2374 = vrsqrt.f32 %v1210_v14  ;;  %v1180_v57 = vmul.f32 0.0078125, %v1137_v3  ;;  %v3433_v16 = vpop.f32.mrb[15].mxu1  ;;  %v3436_v48 = vadd.f32 %v860_v31, %v3255_v40  ;;  %v866_v35 = vpop.f32.mrb[36].mxu0  ;;  %v1331_v11 = vmul.f32 %v3365_v34, %v1267_v7 }
 0x1bc   : > { %v2367_v17 = vpop.eup %2366  ;;  %2376 = vrsqrt.f32 %v1209_v38  ;;  %v1211_v15 = vadd.f32 1e-06, %v1179_v2  ;;  %v868_v52 = vpop.f32.mrb[37].mxu0  ;;  %v1388_v33 = vpack.c.bf16 %v1361_v58, %v1360_v41  ;;  %v1362_v8 = vadd.f32 %v1330_v19, %v3343_v5 }
 0x1bd   : > { %v1212_v6 = vadd.f32 1e-06, %v1180_v57  ;;  %v1139_v28 = vpop.xlane.xlu1 %1138  ;;  %v1268_v18 = vmul.f32 %v2365_v55, %v3125_v56  ;;  %v2369_v9 = vpop.eup %2368  ;;  %v3441_v50 = vadd.f32 1.0, %v859_v54  ;;  %v1363_v38 = vadd.f32 %v1331_v11, %v3348_v53 }
 0x1be   : > { %2378 = vrsqrt.f32 %v1211_v15  ;;  %v870_v4 = vpop.f32.mrb[38].mxu0  ;;  %v1181_v31 = vmul.f32 0.0078125, %v1139_v28  ;;  %v1141_v14 = vpop.xlane.xlu0 %1140  ;;  %v3444_v12 = vadd.f32 1.0, %v863_v36  ;;  %2082 = vmatprep.mubr.bf16.mxu1 %v1388_v33  ;;  %v1269_v23 = vmul.f32 %v2367_v17, %v3128_v21 }
 0x1bf   : > { %2380 = vrsqrt.f32 %v1212_v6  ;;  %v872_v34 = vpop.f32.mrb[39].mxu0  ;;  %v1182_v39 = vmul.f32 0.0078125, %v1141_v14  ;;  %v869_v56 = vadd.f32 %v868_v52, %v3251_v10  ;;  %v1389_v55 = vpack.c.bf16 %v1363_v38, %v1362_v8 }
 0x1c0   : > { %v2371_v5 = vpop.eup %2370  ;;  %v873_v54 = vadd.f32 %v872_v34, %v3251_v10  ;;  %v1213_v7 = vadd.f32 1e-06, %v1181_v31  ;;  %v1332_v41 = vmul.f32 %v3377_v61, %v1268_v18  ;;  %v1333_v53 = vmul.f32 %v3379_v51, %v1269_v23  ;;  %v876_v6 = vpop.f32.mrb[40].mxu0 }
 0x1c1   : > { %v1214_v2 = vadd.f32 1e-06, %v1182_v39  ;;  %v1143_v3 = vpop.xlane.xlu1 %1142  ;;  %v1270_v36 = vmul.f32 %v2369_v9, %v3138_v60  ;;  %v867_v57 = vadd.f32 %v866_v35, %v3255_v40  ;;  %2083 = vmatmul.mubr.bf16.gmra.mrb[24].mxu1 %v1389_v55  ;;  %v1271_v19 = vmul.f32 %v2371_v5, %v3141_v32  ;;  %v878_v8 = vpop.f32.mrb[41].mxu0 }
 0x1c2   : > { %2382 = vrsqrt.f32 %v1213_v7  ;;  %v1183_v58 = vmul.f32 0.0078125, %v1143_v3  ;;  %v1145_v21 = vpop.xlane.xlu0 %1144  ;;  %v1364_v15 = vadd.f32 %v1332_v41, %v3369_v63  ;;  %v1365_v11 = vadd.f32 %v1333_v53, %v3374_v29  ;;  %v880_v38 = vpop.f32.mrb[42].mxu0 }
 0x1c3   : > { %2384 = vrsqrt.f32 %v1214_v2  ;;  %v1184_v17 = vmul.f32 0.0078125, %v1145_v21  ;;  %v2373_v52 = vpop.eup %2372  ;;  %v1306_v61 = vadd.f32 1.0, %v869_v56  ;;  %v871_v51 = vadd.f32 %v870_v4, %v3255_v40 }
 0x1c4   : > { %v1215_v60 = vadd.f32 1e-06, %v1183_v58  ;;  %v1334_v35 = vmul.f32 %v3411_v47, %v1270_v36  ;;  %v1307_v33 = vadd.f32 1.0, %v873_v54  ;;  %v1390_v32 = vpack.c.bf16 %v1365_v11, %v1364_v15  ;;  %v882_v47 = vpop.f32.mrb[43].mxu0 }
 0x1c5   : > { %v2375_v28 = vpop.eup %2374  ;;  %v1216_v18 = vadd.f32 1e-06, %v1184_v17  ;;  %v1147_v9 = vpop.xlane.xlu1 %1146  ;;  %v1335_v31 = vmul.f32 %v3413_v44, %v1271_v19  ;;  %v879_v29 = vadd.f32 %v878_v8, %v3251_v10  ;;  %v877_v39 = vadd.f32 %v876_v6, %v3255_v40 }
 0x1c6   : > { %v2377_v14 = vpop.eup %2376  ;;  %v1274_v63 = vmul.f32 %v2375_v28, %v3164_v43  ;;  %2386 = vrsqrt.f32 %v1215_v60  ;;  %v1185_v4 = vmul.f32 0.0078125, %v1147_v9  ;;  %v1149_v34 = vpop.xlane.xlu0 %1148  ;;  %2086 = vmatprep.mubr.bf16.mxu1 %v1390_v32  ;;  %v1366_v5 = vadd.f32 %v1334_v35, %v3403_v45  ;;  %v3714_v45 = vld [vmem:[#allocation17_spill] sm:$0xff] }
 0x1c7   : > { %v1186_v23 = vmul.f32 0.0078125, %v1149_v34  ;;  %v1272_v56 = vmul.f32 %v2373_v52, %v3151_v62  ;;  %2388 = vrsqrt.f32 %v1216_v18  ;;  %v883_v43 = vadd.f32 %v882_v47, %v3251_v10 }
 0x1c8   : > { %v2379_v54 = vpop.eup %2378  ;;  %v1338_v44 = vmul.f32 %v1306_v61, %v1274_v63  ;;  %v1217_v7 = vadd.f32 1e-06, %v1185_v4  ;;  %v1367_v53 = vadd.f32 %v1335_v31, %v3406_v37  ;;  %v1273_v36 = vmul.f32 %v2377_v14, %v3154_v42  ;;  %v3716_v14 = vld [vmem:[#allocation19_spill] sm:$0xff] }
 0x1c9   : > { %v2381_v55 = vpop.eup %2380  ;;  %v1275_v2 = vmul.f32 %v2379_v54, %v3167_v49  ;;  %v1218_v3 = vadd.f32 1e-06, %v1186_v23  ;;  %v1151_v41 = vpop.xlane.xlu1 %1150  ;;  %v1308_v62 = vadd.f32 1.0, %v879_v29  ;;  %v1309_v19 = vadd.f32 1.0, %v883_v43 }
 0x1ca   : > { %v3468_v58 = vadd.f32 %v1338_v44, %v867_v57  ;;  %v1276_v21 = vmul.f32 %v2381_v55, %v3714_v45  ;;  %v1153_v17 = vpop.xlane.xlu0 %1152  ;;  %v1187_v11 = vmul.f32 0.0078125, %v1151_v41  ;;  %v1391_v52 = vpack.c.bf16 %v1367_v53, %v1366_v5  ;;  %v886_v49 = vpop.f32.mrb[44].mxu0  ;;  %v3715_v57 = vld [vmem:[#allocation18_spill] sm:$0xff]  ;;  %v3717_v44 = vld [vmem:[#allocation20_spill] sm:$0xff] }
 0x1cb   : > { %v1339_v15 = vmul.f32 %v1307_v33, %v1275_v2  ;;  %2390 = vrsqrt.f32 %v1218_v3  ;;  %v1188_v60 = vmul.f32 0.0078125, %v1153_v17  ;;  %v1336_v37 = vmul.f32 %v3441_v50, %v1272_v56  ;;  %v888_v8 = vpop.f32.mrb[45].mxu0 }
 0x1cc   : > { %v2383_v61 = vpop.eup %2382  ;;  %v1340_v6 = vmul.f32 %v1308_v62, %v1276_v21  ;;  %2392 = vrsqrt.f32 %v1217_v7  ;;  %v1219_v18 = vadd.f32 1e-06, %v1187_v11  ;;  %2087 = vmatmul.mubr.bf16.gmra.mrb[28].mxu1 %v1391_v52  ;;  %v1337_v33 = vmul.f32 %v3444_v12, %v1273_v36  ;;  %v890_v4 = vpop.f32.mrb[46].mxu0 }
 0x1cd   : > { %v2385_v35 = vpop.eup %2384  ;;  %v1371_v42 = vadd.f32 %v1339_v15, %v871_v51  ;;  %v1277_v28 = vmul.f32 %v2383_v61, %v3715_v57  ;;  %v1155_v9 = vpop.xlane.xlu1 %1154  ;;  %v889_v31 = vadd.f32 %v888_v8, %v3251_v10  ;;  %v1220_v29 = vadd.f32 1e-06, %v1188_v60  ;;  %v3718_v60 = vld [vmem:[#allocation11_spill] sm:$0xff]  ;;  %v3721_v8 = vld [vmem:[#allocation25_spill] sm:$0xff] }
 0x1ce   : > { %v1372_v32 = vadd.f32 %v1340_v6, %v877_v39  ;;  %v1278_v63 = vmul.f32 %v2385_v35, %v3716_v14  ;;  %v881_v34 = vadd.f32 %v880_v38, %v3255_v40  ;;  %2394 = vrsqrt.f32 %v1219_v18  ;;  %v892_v51 = vpop.f32.mrb[47].mxu0  ;;  %v1157_v23 = vpop.xlane.xlu0 %1156 }
 0x1cf   : > { %v1341_v50 = vmul.f32 %v1309_v19, %v1277_v28  ;;  %v1189_v47 = vmul.f32 0.0078125, %v1155_v9  ;;  %v1310_v56 = vadd.f32 1.0, %v889_v31  ;;  %2396 = vrsqrt.f32 %v1220_v29  ;;  %v3722_v31 = vld [vmem:[#allocation24_spill] sm:$0xff] }
 0x1d0   : > { %v2387_v5 = vpop.eup %2386  ;;  %v893_v54 = vadd.f32 %v892_v51, %v3251_v10  ;;  %v1368_v12 = vadd.f32 %v1336_v37, %v3416_v1  ;;  %v1369_v55 = vadd.f32 %v1337_v33, %v3436_v48  ;;  %v887_v3 = vadd.f32 %v886_v49, %v3255_v40 }
 0x1d1   : > { %v1373_v39 = vadd.f32 %v1341_v50, %v881_v34  ;;  %v1279_v43 = vmul.f32 %v2387_v5, %v3717_v44  ;;  %v1221_v7 = vadd.f32 1e-06, %v1189_v47  ;;  %v1159_v2 = vpop.xlane.xlu1 %1158  ;;  %v2389_v38 = vpop.eup %2388  ;;  %v1342_v41 = vmul.f32 %v1310_v56, %v1278_v63  ;;  %v3725_v47 = vld [vmem:[#allocation12_spill] sm:$0xff]  ;;  %v3726_v56 = vld [vmem:[#allocation13_spill] sm:$0xff] }
 0x1d2   : > { %v1311_v53 = vadd.f32 1.0, %v893_v54  ;;  %v1190_v36 = vmul.f32 0.0078125, %v1157_v23  ;;  %v891_v45 = vadd.f32 %v890_v4, %v3255_v40  ;;  %v1392_v21 = vpack.c.bf16 %v1369_v55, %v1368_v12  ;;  %v3724_v4 = vld [vmem:[#allocation10_spill] sm:$0xff] }
 0x1d3   : > { %2398 = vrsqrt.f32 %v1221_v7  ;;  %v1191_v62 = vmul.f32 0.0078125, %v1159_v2  ;;  %v1374_v19 = vadd.f32 %v1342_v41, %v887_v3  ;;  %v1393_v15 = vpack.c.bf16 %v1371_v42, %v3468_v58  ;;  %v3719_v58 = vld [vmem:[#allocation22_spill] sm:$0xff] }
 0x1d4   : > { %v1343_v1 = vmul.f32 %v1311_v53, %v1279_v43  ;;  %v1222_v17 = vadd.f32 1e-06, %v1190_v36  ;;  %v1314_v48 = vadd.f32 1.0, %v3383_v0  ;;  %v913_v52 = vadd.f32 %v3363_v24, %v3251_v10  ;;  %2090 = vmatprep.mubr.bf16.mxu1 %v1392_v21  ;;  %v3720_v0 = vld [vmem:[#allocation23_spill] sm:$0xff] }
 0x1d5   : > { %v2391_v11 = vpop.eup %2390  ;;  %v919_v61 = vadd.f32 %v3390_v46, %v3251_v10  ;;  %v1223_v6 = vadd.f32 1e-06, %v1191_v62  ;;  %2091 = vmatmul.mubr.bf16.gmra.mrb[32].mxu1 %v1393_v15  ;;  %v1394_v57 = vpack.c.bf16 %v1373_v39, %v1372_v32  ;;  %v897_v42 = vadd.f32 %v3719_v58, %v3255_v40  ;;  %v3723_v32 = vld [vmem:[#allocation21_spill] sm:$0xff] }
 0x1d6   : > { %v2393_v49 = vpop.eup %2392  ;;  %v1282_v37 = vmul.f32 %v2391_v11, %v3718_v60  ;;  %v1375_v35 = vadd.f32 %v1343_v1, %v891_v45  ;;  %2400 = vrsqrt.f32 %v1222_v17  ;;  %v901_v28 = vadd.f32 %v3720_v0, %v3255_v40  ;;  %v3728_v11 = vld [vmem:[#allocation15_spill] sm:$0xff] }
 0x1d7   : > { %2402 = vrsqrt.f32 %v1223_v6  ;;  %v1312_v24 = vadd.f32 1.0, %v3332_v22  ;;  %v907_v46 = vadd.f32 %v3721_v8, %v3255_v40  ;;  %2094 = vmatprep.mubr.bf16.mxu1 %v1394_v57  ;;  %v1313_v14 = vadd.f32 1.0, %v3722_v31 }
 0x1d8   : > { %v1346_v18 = vmul.f32 %v1314_v48, %v1282_v37  ;;  %v1395_v9 = vpack.c.bf16 %v1375_v35, %v1374_v19  ;;  %v2395_v33 = vpop.eup %2394  ;;  %v1315_v63 = vadd.f32 1.0, %v913_v52  ;;  %v1280_v29 = vmul.f32 %v2389_v38, %v3723_v32 }
 0x1d9   : > { %v1281_v34 = vmul.f32 %v2393_v49, %v3724_v4  ;;  %v2397_v50 = vpop.eup %2396  ;;  %v1283_v23 = vmul.f32 %v2395_v33, %v3725_v47  ;;  %v1316_v5 = vadd.f32 1.0, %v919_v61  ;;  %v923_v22 = vadd.f32 %v3399_v20, %v3251_v10  ;;  %v3727_v20 = vld [vmem:[#allocation14_spill] sm:$0xff]  ;;  %v3729_v61 = vld [vmem:[#allocation16_spill] sm:$0xff] }
 0x1da   : > { %v1378_v51 = vadd.f32 %v1346_v18, %v907_v46  ;;  %v1284_v54 = vmul.f32 %v2397_v50, %v3726_v56  ;;  %v929_v12 = vadd.f32 %v3425_v13, %v3251_v10  ;;  %v1344_v39 = vmul.f32 %v1312_v24, %v1280_v29 }
 0x1db   : > { %v1345_v44 = vmul.f32 %v1313_v14, %v1281_v34  ;;  %v911_v43 = vadd.f32 %v3359_v30, %v3255_v40  ;;  %v1347_v7 = vmul.f32 %v1315_v63, %v1283_v23  ;;  %v917_v2 = vadd.f32 %v3385_v26, %v3255_v40 }
 0x1dc   : > { %v1348_v38 = vmul.f32 %v1316_v5, %v1284_v54  ;;  %v1376_v3 = vadd.f32 %v1344_v39, %v897_v42  ;;  %v1317_v45 = vadd.f32 1.0, %v923_v22  ;;  %v933_v13 = vadd.f32 %v3433_v16, %v3251_v10  ;;  %v3525_v42 = vld [vmem:[%s3646_s5] ss:$0 sm:$0xff] }
 0x1dd   : > { %v2399_v55 = vpop.eup %2398  ;;  %v1377_v41 = vadd.f32 %v1345_v44, %v901_v28  ;;  %v1379_v53 = vadd.f32 %v1347_v7, %v911_v43  ;;  %2095 = vmatmul.mubr.bf16.gmra.mrb[36].mxu1 %v1395_v9  ;;  %v1318_v62 = vadd.f32 1.0, %v929_v12  ;;  %v921_v1 = vadd.f32 %v3394_v25, %v3255_v40 }
 0x1de   : > { %v1285_v36 = vmul.f32 %v2399_v55, %v3727_v20  ;;  %v1380_v21 = vadd.f32 %v1348_v38, %v917_v2  ;;  %v1319_v49 = vadd.f32 1.0, %v933_v13  ;;  %v927_v10 = vadd.f32 %v3420_v27, %v3255_v40 }
 0x1df   : > { %v1396_v19 = vpack.c.bf16 %v1377_v41, %v1376_v3  ;;  %v1397_v26 = vpack.c.bf16 %v1379_v53, %v1378_v51  ;;  %v931_v60 = vadd.f32 %v3429_v59, %v3255_v40 }
 0x1e0   : > { %v2401_v30 = vpop.eup %2400  ;;  %v1349_v17 = vmul.f32 %v1317_v45, %v1285_v36 }
 0x1e1   : > { %v2403_v15 = vpop.eup %2402  ;;  %v1286_v48 = vmul.f32 %v2401_v30, %v3728_v11  ;;  %2098 = vmatprep.mubr.bf16.mxu1 %v1396_v19 }
 0x1e2   : > { %v1381_v52 = vadd.f32 %v1349_v17, %v921_v1  ;;  %v1287_v6 = vmul.f32 %v2403_v15, %v3729_v61 }
 0x1e3   : > { %v1350_v16 = vmul.f32 %v1318_v62, %v1286_v48 }
 0x1e4   : > { %v1351_v37 = vmul.f32 %v1319_v49, %v1287_v6  ;;  %v1398_v25 = vpack.c.bf16 %v1381_v52, %v1380_v21 }
 0x1e5   : > { %v1382_v35 = vadd.f32 %v1350_v16, %v927_v10  ;;  %2099 = vmatmul.mubr.bf16.gmra.mrb[40].mxu1 %v1397_v26 }
 0x1e6   : > { %v1383_v57 = vadd.f32 %v1351_v37, %v931_v60  ;;  %2102 = vmatprep.mubr.bf16.mxu1 %v1398_v25 }
 0x1e8   : > { %v1399_v58 = vpack.c.bf16 %v1383_v57, %v1382_v35 }
 0x1ed   : > { %2103 = vmatmul.mubr.bf16.gmra.mrb[44].mxu1 %v1399_v58 }
 0x284   : > { %v2076_v27 = vpop.f32.mrb[16].mxu1 }
 0x285   : > { %v1514_v40 = vadd.f32 %v2076_v27, %v3525_v42  ;;  %v1505_v59 = vpop.f32.mrb[17].mxu1 }
 0x286   : > { %v1506_v0 = vadd.f32 %v3525_v42, %v1505_v59  ;;  %v2077_v28 = vpop.f32.mrb[18].mxu1 }
 0x287   : > { %v2004_v24 = vpack.c.bf16 %v1514_v40, %v1514_v40  ;;  %v1517_v8 = vadd.f32 %v2077_v28, %v3525_v42  ;;  %v1508_v46 = vpop.f32.mrb[19].mxu1 }
 0x288   : > { %v2002_v18 = vpack.c.bf16 %v1506_v0, %v1506_v0  ;;  %v1509_v9 = vadd.f32 %v3525_v42, %v1508_v46 }
 0x289   : > { %1763 = vst.msk [vmem:[%s3531_s9 + $0x8] sm:$0xf] %vm1760_vm0, %v2004_v24  ;;  %v2005_v33 = vpack.c.bf16 %v1517_v8, %v1517_v8 }
 0x28a   : > { %1761 = vst.msk [vmem:[%s3531_s9] sm:$0xf] %vm1760_vm0, %v2002_v18  ;;  %v2003_v31 = vpack.c.bf16 %v1509_v9, %v1509_v9 }
 0x28b   : > { %1764 = vst.msk [vmem:[%s3531_s9 + $0xc] sm:$0xf] %vm1760_vm0, %v2005_v33 }
 0x28c   : > { %1762 = vst.msk [vmem:[%s3531_s9 + $0x4] sm:$0xf] %vm1760_vm0, %v2003_v31  ;;  %v2080_v14 = vpop.f32.mrb[20].mxu1 }
 0x28d   : > { %v1530_v63 = vadd.f32 %v2080_v14, %v3525_v42  ;;  %v1521_v32 = vpop.f32.mrb[21].mxu1 }
 0x28e   : > { %v1522_v29 = vadd.f32 %v3525_v42, %v1521_v32  ;;  %v2081_v4 = vpop.f32.mrb[22].mxu1 }
 0x28f   : > { %v2008_v34 = vpack.c.bf16 %v1530_v63, %v1530_v63  ;;  %v1533_v50 = vadd.f32 %v2081_v4, %v3525_v42  ;;  %v1524_v51 = vpop.f32.mrb[23].mxu1 }
 0x290   : > { %v2006_v47 = vpack.c.bf16 %v1522_v29, %v1522_v29  ;;  %v1525_v23 = vadd.f32 %v3525_v42, %v1524_v51 }
 0x291   : > { %1767 = vst.msk [vmem:[%s3531_s9 + $0x18] sm:$0xf] %vm1760_vm0, %v2008_v34  ;;  %v2009_v5 = vpack.c.bf16 %v1533_v50, %v1533_v50 }
 0x292   : > { %1765 = vst.msk [vmem:[%s3531_s9 + $0x10] sm:$0xf] %vm1760_vm0, %v2006_v47  ;;  %v2007_v22 = vpack.c.bf16 %v1525_v23, %v1525_v23 }
 0x293   : > { %1768 = vst.msk [vmem:[%s3531_s9 + $0x1c] sm:$0xf] %vm1760_vm0, %v2009_v5 }
 0x294   : > { %1766 = vst.msk [vmem:[%s3531_s9 + $0x14] sm:$0xf] %vm1760_vm0, %v2007_v22  ;;  %v2084_v56 = vpop.f32.mrb[24].mxu1 }
 0x295   : > { %v1546_v54 = vadd.f32 %v2084_v56, %v3525_v42  ;;  %v1537_v12 = vpop.f32.mrb[25].mxu1 }
 0x296   : > { %v1538_v39 = vadd.f32 %v3525_v42, %v1537_v12  ;;  %v2085_v44 = vpop.f32.mrb[26].mxu1 }
 0x297   : > { %v2012_v43 = vpack.c.bf16 %v1546_v54, %v1546_v54  ;;  %v1549_v7 = vadd.f32 %v2085_v44, %v3525_v42  ;;  %v1540_v55 = vpop.f32.mrb[27].mxu1 }
 0x298   : > { %v2010_v2 = vpack.c.bf16 %v1538_v39, %v1538_v39  ;;  %v1541_v38 = vadd.f32 %v3525_v42, %v1540_v55 }
 0x299   : > { %1771 = vst.msk [vmem:[%s3531_s9 + $0x28] sm:$0xf] %vm1760_vm0, %v2012_v43  ;;  %v2013_v3 = vpack.c.bf16 %v1549_v7, %v1549_v7 }
 0x29a   : > { %1769 = vst.msk [vmem:[%s3531_s9 + $0x20] sm:$0xf] %vm1760_vm0, %v2010_v2  ;;  %v2011_v41 = vpack.c.bf16 %v1541_v38, %v1541_v38 }
 0x29b   : > { %1772 = vst.msk [vmem:[%s3531_s9 + $0x2c] sm:$0xf] %vm1760_vm0, %v2013_v3 }
 0x29c   : > { %1770 = vst.msk [vmem:[%s3531_s9 + $0x24] sm:$0xf] %vm1760_vm0, %v2011_v41 }
 0x29f   : > { %v2088_v53 = vpop.f32.mrb[28].mxu1 }
 0x2a0   : > { %v1562_v20 = vadd.f32 %v2088_v53, %v3525_v42  ;;  %v1553_v36 = vpop.f32.mrb[29].mxu1 }
 0x2a1   : > { %v1554_v45 = vadd.f32 %v3525_v42, %v1553_v36  ;;  %v2089_v13 = vpop.f32.mrb[30].mxu1 }
 0x2a2   : > { %v2016_v21 = vpack.c.bf16 %v1562_v20, %v1562_v20  ;;  %v1565_v62 = vadd.f32 %v2089_v13, %v3525_v42  ;;  %v1556_v19 = vpop.f32.mrb[31].mxu1 }
 0x2a3   : > { %v2014_v30 = vpack.c.bf16 %v1554_v45, %v1554_v45  ;;  %v1557_v1 = vadd.f32 %v3525_v42, %v1556_v19 }
 0x2a4   : > { %1775 = vst.msk [vmem:[%s3531_s9 + $0x38] sm:$0xf] %vm1760_vm0, %v2016_v21  ;;  %v2017_v17 = vpack.c.bf16 %v1565_v62, %v1565_v62 }
 0x2a5   : > { %1773 = vst.msk [vmem:[%s3531_s9 + $0x30] sm:$0xf] %vm1760_vm0, %v2014_v30  ;;  %v2015_v26 = vpack.c.bf16 %v1557_v1, %v1557_v1 }
 0x2a6   : > { %1776 = vst.msk [vmem:[%s3531_s9 + $0x3c] sm:$0xf] %vm1760_vm0, %v2017_v17 }
 0x2a7   : > { %1774 = vst.msk [vmem:[%s3531_s9 + $0x34] sm:$0xf] %vm1760_vm0, %v2015_v26 }
 0x2a8   : > { %v2092_v15 = vpop.f32.mrb[32].mxu1 }
 0x2a9   : > { %v1578_v11 = vadd.f32 %v2092_v15, %v3525_v42  ;;  %v1569_v48 = vpop.f32.mrb[33].mxu1 }
 0x2aa   : > { %v1570_v52 = vadd.f32 %v3525_v42, %v1569_v48  ;;  %v2093_v61 = vpop.f32.mrb[34].mxu1 }
 0x2ab   : > { %v2020_v6 = vpack.c.bf16 %v1578_v11, %v1578_v11  ;;  %v1581_v49 = vadd.f32 %v2093_v61, %v3525_v42  ;;  %v1572_v10 = vpop.f32.mrb[35].mxu1 }
 0x2ac   : > { %v2018_v16 = vpack.c.bf16 %v1570_v52, %v1570_v52  ;;  %v1573_v60 = vadd.f32 %v3525_v42, %v1572_v10 }
 0x2ad   : > { %1779 = vst.msk [vmem:[%s3531_s9 + $0x48] sm:$0xf] %vm1760_vm0, %v2020_v6  ;;  %v2021_v37 = vpack.c.bf16 %v1581_v49, %v1581_v49 }
 0x2ae   : > { %1777 = vst.msk [vmem:[%s3531_s9 + $0x40] sm:$0xf] %vm1760_vm0, %v2018_v16  ;;  %v2019_v25 = vpack.c.bf16 %v1573_v60, %v1573_v60 }
 0x2af   : > { %1780 = vst.msk [vmem:[%s3531_s9 + $0x4c] sm:$0xf] %vm1760_vm0, %v2021_v37 }
 0x2b0   : > { %1778 = vst.msk [vmem:[%s3531_s9 + $0x44] sm:$0xf] %vm1760_vm0, %v2019_v25  ;;  %v2096_v35 = vpop.f32.mrb[36].mxu1 }
 0x2b1   : > { %v1594_v57 = vadd.f32 %v2096_v35, %v3525_v42  ;;  %v1585_v58 = vpop.f32.mrb[37].mxu1 }
 0x2b2   : > { %v1586_v27 = vadd.f32 %v3525_v42, %v1585_v58  ;;  %v2097_v40 = vpop.f32.mrb[38].mxu1 }
 0x2b3   : > { %v2024_v59 = vpack.c.bf16 %v1594_v57, %v1594_v57  ;;  %v1597_v0 = vadd.f32 %v2097_v40, %v3525_v42  ;;  %v1588_v28 = vpop.f32.mrb[39].mxu1 }
 0x2b4   : > { %v2022_v24 = vpack.c.bf16 %v1586_v27, %v1586_v27  ;;  %v1589_v8 = vadd.f32 %v3525_v42, %v1588_v28 }
 0x2b5   : > { %1783 = vst.msk [vmem:[%s3531_s9 + $0x58] sm:$0xf] %vm1760_vm0, %v2024_v59  ;;  %v2025_v46 = vpack.c.bf16 %v1597_v0, %v1597_v0 }
 0x2b6   : > { %1781 = vst.msk [vmem:[%s3531_s9 + $0x50] sm:$0xf] %vm1760_vm0, %v2022_v24  ;;  %v2023_v18 = vpack.c.bf16 %v1589_v8, %v1589_v8 }
 0x2b7   : > { %1784 = vst.msk [vmem:[%s3531_s9 + $0x5c] sm:$0xf] %vm1760_vm0, %v2025_v46 }
 0x2b8   : > { %1782 = vst.msk [vmem:[%s3531_s9 + $0x54] sm:$0xf] %vm1760_vm0, %v2023_v18  ;;  %v2100_v9 = vpop.f32.mrb[40].mxu1 }
 0x2b9   : > { %v1610_v33 = vadd.f32 %v2100_v9, %v3525_v42  ;;  %v1601_v31 = vpop.f32.mrb[41].mxu1 }
 0x2ba   : > { %v1602_v14 = vadd.f32 %v3525_v42, %v1601_v31  ;;  %v2101_v63 = vpop.f32.mrb[42].mxu1 }
 0x2bb   : > { %v2028_v32 = vpack.c.bf16 %v1610_v33, %v1610_v33  ;;  %v1613_v29 = vadd.f32 %v2101_v63, %v3525_v42  ;;  %v1604_v4 = vpop.f32.mrb[43].mxu1 }
 0x2bc   : > { %v2026_v34 = vpack.c.bf16 %v1602_v14, %v1602_v14  ;;  %v1605_v50 = vadd.f32 %v3525_v42, %v1604_v4 }
 0x2bd   : > { %1787 = vst.msk [vmem:[%s3531_s9 + $0x68] sm:$0xf] %vm1760_vm0, %v2028_v32  ;;  %v2029_v51 = vpack.c.bf16 %v1613_v29, %v1613_v29 }
 0x2be   : > { %1785 = vst.msk [vmem:[%s3531_s9 + $0x60] sm:$0xf] %vm1760_vm0, %v2026_v34  ;;  %v2027_v47 = vpack.c.bf16 %v1605_v50, %v1605_v50 }
 0x2bf   : > { %1788 = vst.msk [vmem:[%s3531_s9 + $0x6c] sm:$0xf] %vm1760_vm0, %v2029_v51 }
 0x2c0   : > { %1786 = vst.msk [vmem:[%s3531_s9 + $0x64] sm:$0xf] %vm1760_vm0, %v2027_v47  ;;  %v2104_v23 = vpop.f32.mrb[44].mxu1 }
 0x2c1   : > { %v1626_v5 = vadd.f32 %v2104_v23, %v3525_v42  ;;  %v1617_v22 = vpop.f32.mrb[45].mxu1 }
 0x2c2   : > { %v1618_v56 = vadd.f32 %v3525_v42, %v1617_v22  ;;  %v2105_v54 = vpop.f32.mrb[46].mxu1 }
 0x2c3   : > { %v2032_v12 = vpack.c.bf16 %v1626_v5, %v1626_v5  ;;  %v1629_v39 = vadd.f32 %v2105_v54, %v3525_v42  ;;  %v1620_v44 = vpop.f32.mrb[47].mxu1 }
 0x2c4   : > { %v2030_v43 = vpack.c.bf16 %v1618_v56, %v1618_v56  ;;  %v1621_v7 = vadd.f32 %v3525_v42, %v1620_v44 }
 0x2c5   : > { %1791 = vst.msk [vmem:[%s3531_s9 + $0x78] sm:$0xf] %vm1760_vm0, %v2032_v12  ;;  %v2033_v55 = vpack.c.bf16 %v1629_v39, %v1629_v39 }
 0x2c6   : > { %1789 = vst.msk [vmem:[%s3531_s9 + $0x70] sm:$0xf] %vm1760_vm0, %v2030_v43  ;;  %v2031_v2 = vpack.c.bf16 %v1621_v7, %v1621_v7 }
 0x2c7   : > { %1792 = vst.msk [vmem:[%s3531_s9 + $0x7c] sm:$0xf] %vm1760_vm0, %v2033_v55 }
 0x2c8   : > { %1790 = vst.msk [vmem:[%s3531_s9 + $0x74] sm:$0xf] %vm1760_vm0, %v2031_v2 }
 0x2c9 PF: > { %p19_p9 = scmp.ge.s32.totalorder %s2621_s7, 4   ;;  %s3730_s21 = smov %s2526_s22 }
 0x2ca   : > { %s3731_s22 = smov %s2530_s23  ;;  %s3732_s23 = smov %s2650_s28 }
 0x2cb   : > { %s3733_s24 = smov %s2621_s7  ;;  %21 = sbr.rel (!%p19_p9) target bundleno = 5 (0x5), region = 101 }
 0x2d2   :  { %1815 = vsyncpa [#allocation3], 1 }
 0x2d3   :  { %1817 = vsyncpa [#allocation3 + $0x1], 1 }
 0x2d4   :  { %1818 = vsyncpa [#allocation5], 1 }
 0x2d5   :  { %1820 = vsyncpa [#allocation5 + $0x1], 1 }

</bundles_post_ra>
